<compile_context>
chip_gen: v6e
topology: v6e:2x2x1
jax: 0.10.0
libtpu: 0.0.40
codegen_flags: <defaults>
</compile_context>

<pallas_src>
import math
import numpy as np
import jax
import jax.numpy as jnp
from jax.experimental import pallas as pl
from jax.experimental.pallas import tpu as pltpu

BN_EPS = 1e-5


def _round_up(x, m):
    return ((x + m - 1) // m) * m


# ----------------------------------------------------------------------------
# Host-side constant folding (one-time, parameters only — no activation traffic)
# ----------------------------------------------------------------------------
def conv1d_toeplitz(w, L_in, stride, dilation, padding):
    """Dense matrix T such that  flat_out = flat_in @ T  with channels-last
    flattening (row index = l_in*C_in + c_in, col index = l_out*C_out + c_out).
    Zero padding is folded in by dropping out-of-range taps."""
    w = np.asarray(w, np.float32)                      # (C_out, C_in, K)
    c_out, c_in, k = w.shape
    l_pad = L_in + 2 * padding
    l_out = (l_pad - dilation * (k - 1) - 1) // stride + 1
    T = np.zeros((L_in * c_in, l_out * c_out), np.float32)
    for lo in range(l_out):
        for t in range(k):
            li = lo * stride + t * dilation - padding
            if 0 <= li < L_in:
                T[li * c_in:(li + 1) * c_in,
                  lo * c_out:(lo + 1) * c_out] = w[:, :, t].T
    return T, l_out


def pack_advrtset(params, cfg, nbeats):
    """Fold the whole module into a flat operand list + static per-layer meta.

    Conv layers -> (T, S, S^T, gb); Linear layers -> (M, gb).
      T / M : matmul matrix (bf16, channels-last layout for conv; first Linear
              weight permuted so torch's (C, L) flatten order is preserved).
              Column/row dims zero-padded to multiples of 128 (lane-dense).
      S     : (N_pad, C) f32 0/1 matrix summing columns per channel.
      gb    : packed gamma / beta (f32); zero in padded columns.
    Conv/Linear biases are intentionally dropped (no-op under training BN)."""
    operands, meta = [], []
    L, C = nbeats, 1
    n_in_real = nbeats * 1
    n_in_pad = _round_up(n_in_real, 128)
    n0_pad = n_in_pad

    for (w, b, g, beta), k, s, d, p in zip(
            params["conv"], cfg["ker_size"], cfg["stride"], cfg["dial"], cfg["pad"]):
        c_out = int(w.shape[0])
        T, L_out = conv1d_toeplitz(w, L, s, d, p)
        n_real = L_out * c_out
        n_pad = _round_up(n_real, 128)
        T_pad = np.zeros((n_in_pad, n_pad), np.float32)
        T_pad[:n_in_real, :n_real] = T
        S = np.zeros((n_pad, c_out), np.float32)
        S[:n_real, :] = np.tile(np.eye(c_out, dtype=np.float32), (L_out, 1))
        gb = np.stack([np.asarray(g, np.float32), np.asarray(beta, np.float32)])
        operands += [jnp.asarray(T_pad, jnp.bfloat16), jnp.asarray(S),
                     jnp.asarray(S.T), jnp.asarray(gb)]
        meta.append((True, L_out, c_out))
        L, C = L_out, c_out
        n_in_real, n_in_pad = n_real, n_pad

    first = True
    for (w, b, g, beta) in params["lin"]:
        w = np.asarray(w, np.float32)
        h = int(w.shape[0])
        h_pad = _round_up(h, 128)
        if first:
            # torch flatten order is c*L + l ; our activation columns are l*C + c.
            M = np.transpose(w.reshape(h, C, L), (2, 1, 0)).reshape(L * C, h)
            first = False
        else:
            M = w.T
        M_pad = np.zeros((n_in_pad, h_pad), np.float32)
        M_pad[:n_in_real, :h] = M
        gb_pad = np.zeros((2, h_pad), np.float32)
        gb_pad[0, :h] = np.asarray(g, np.float32)
        gb_pad[1, :h] = np.asarray(beta, np.float32)
        operands += [jnp.asarray(M_pad, jnp.bfloat16), jnp.asarray(gb_pad)]
        meta.append((False, 1, h))
        n_in_real, n_in_pad = h, h_pad

    return operands, meta, n0_pad, n_in_pad   # n_in_pad == padded output width


# ----------------------------------------------------------------------------
# The single fused kernel: all layers, VMEM/vreg-resident activations.
# ----------------------------------------------------------------------------
def make_advrtset_kernel(meta, batch, b_pad):
    need_row_mask = (b_pad != batch)

    def kernel(*refs):
        out_ref = refs[-1]
        it = iter(refs[:-1])
        a = next(it)[...]                                   # (B_pad, N0_pad) f32

        if need_row_mask:
            rows = jax.lax.broadcasted_iota(jnp.int32, (b_pad, 1), 0)
            row_mask = (rows < batch).astype(jnp.float32)   # (B_pad, 1)

        for is_conv, l_out, c_out in meta:
            m_ref = next(it)
            if is_conv:
                s_ref, st_ref = next(it), next(it)
            gb_ref = next(it)

            # layer matmul (conv-as-Toeplitz or linear): bf16 operands, f32 acc
            z = jnp.dot(a.astype(jnp.bfloat16), m_ref[...],
                        preferred_element_type=jnp.float32)          # (B_pad, N_pad)

            # single-pass BN stats: stacked per-column sums, then one matmul
            # with the 0/1 S matrix to aggregate per channel (f32 throughout).
            cs = jnp.sum(z, axis=0, keepdims=True)                    # (1, N_pad)
            css = jnp.sum(z * z, axis=0, keepdims=True)               # (1, N_pad)
            stats = jnp.concatenate([cs, css], axis=0)                # (2, N_pad)
            if is_conv:
                stats = jnp.dot(stats, s_ref[...],
                                preferred_element_type=jnp.float32)   # (2, C)
            inv_n = 1.0 / float(batch * l_out)                        # TRUE counts
            mean = stats[0:1, :] * inv_n
            var = jnp.maximum(stats[1:2, :] * inv_n - mean * mean, 0.0)
            inv_std = jax.lax.rsqrt(var + BN_EPS)

            gb = gb_ref[...]                                          # (2, C or N_pad)
            scale = gb[0:1, :] * inv_std
            shift = gb[1:2, :] - mean * scale
            ss = jnp.concatenate([scale, shift], axis=0)              # (2, C)
            if is_conv:
                # broadcast per-channel scale/shift back over (l*C + c) columns
                ss = jnp.dot(ss, st_ref[...],
                             preferred_element_type=jnp.float32)      # (2, N_pad)

            a = jnp.maximum(z * ss[0:1, :] + ss[1:2, :], 0.0)         # BN + ReLU
            if need_row_mask:
                a = a * row_mask        # keep padded rows exactly zero for next BN

        out_ref[...] = a.astype(out_ref.dtype)
    return kernel


def advrtset_forward(x, operands, meta, n0_pad, hout_pad):
    """x: (B, 1, nbeats) float32 (NCL, same as PyTorch). Whole network in one
    pallas_call; only the final padded (B_pad, H_pad) activation touches HBM."""
    batch = x.shape[0]
    b_pad = _round_up(max(batch, 8), 8)
    # first conv has C_in == 1, so NCL flatten equals the channels-last flatten.
    x_flat = x.reshape(batch, -1).astype(jnp.float32)
    n0 = x_flat.shape[1]
    x_pad = jnp.zeros((b_pad, n0_pad), jnp.float32).at[:batch, :n0].set(x_flat)

    args = [x_pad] + list(operands)
    h_out = meta[-1][2]

    vmem = pl.BlockSpec(memory_space=pltpu.MemorySpace.VMEM)
    out = pl.pallas_call(
        make_advrtset_kernel(meta, batch, b_pad),
        out_shape=jax.ShapeDtypeStruct((b_pad, hout_pad), jnp.float32),
        in_specs=[vmem] * len(args),
        out_specs=vmem,
    )(*args)
    return out[:batch, :h_out]


# ----------------------------------------------------------------------------
# Pure-JAX reference of the module's math (with biases, two-pass BN, im2col).
# The layer matmuls mirror the kernel's bf16-operand / f32-accumulate choice so
# the numerical check stays tight; everything else is f32.
# ----------------------------------------------------------------------------
def _im2col_1d(x_ncl, k, s, d, p):
    if p > 0:
        x_ncl = jnp.pad(x_ncl, ((0, 0), (0, 0), (p, p)))
    B, C, L = x_ncl.shape
    L_out = (L - d * (k - 1) - 1) // s + 1
    idx = jnp.arange(L_out)[:, None] * s + jnp.arange(k)[None, :] * d
    patches = x_ncl[:, :, idx]                       # (B, C, L_out, K)
    patches = jnp.transpose(patches, (0, 2, 1, 3))   # (B, L_out, C, K)
    return patches.reshape(B * L_out, C * k), L_out


def _bn_relu_rows(y, g, beta):
    mean = jnp.mean(y, axis=0, keepdims=True)
    var = jnp.mean((y - mean) ** 2, axis=0, keepdims=True)   # biased var
    return jnp.maximum((y - mean) * jax.lax.rsqrt(var + BN_EPS) * g + beta, 0.0)


def advrtset_reference(x, params, cfg, matmul_dtype=jnp.bfloat16):
    out = x
    for (w, b, g, beta), k, s, d, p in zip(
            params["conv"], cfg["ker_size"], cfg["stride"], cfg["dial"], cfg["pad"]):
        B = out.shape[0]
        cols, L_out = _im2col_1d(out.astype(matmul_dtype), k, s, d, p)
        c_out = w.shape[0]
        y = jnp.dot(cols, w.reshape(c_out, -1).T.astype(matmul_dtype),
                    preferred_element_type=jnp.float32) + b.reshape(1, -1)
        y = _bn_relu_rows(y, g, beta)
        out = jnp.transpose(y.reshape(B, L_out, c_out), (0, 2, 1))  # back to NCL
    out = out.reshape(out.shape[0], -1)                        # torch (C,L) flatten
    for (w, b, g, beta) in params["lin"]:
        y = jnp.dot(out.astype(matmul_dtype), w.T.astype(matmul_dtype),
                    preferred_element_type=jnp.float32) + b.reshape(1, -1)
        out = _bn_relu_rows(y, g, beta)
    return out


# ----------------------------------------------------------------------------
# Deterministic parameter construction (mirrors Advrtset.__init__ shapes)
# ----------------------------------------------------------------------------
def build_config_and_params(nbeats, num_chann, ker_size, stride, dial, pad,
                            num_hidden, key):
    def as_list(v):
        return v if isinstance(v, list) else [v]

    num_chann = as_list(num_chann)
    ker_size, stride, dial, pad = map(as_list, (ker_size, stride, dial, pad))
    if len(num_chann) > 1:
        ker_size = ker_size * len(num_chann) if len(ker_size) == 1 else ker_size
        stride = stride * len(num_chann) if len(stride) == 1 else stride
        dial = dial * len(num_chann) if len(dial) == 1 else dial
        pad = pad * len(num_chann) if len(pad) == 1 else pad
    num_hidden = as_list(num_hidden)

    # conv output length bookkeeping (same floor formula as the module)
    L = math.floor(1 + (nbeats + 2 * pad[0] - dial[0] * (ker_size[0] - 1) - 1) / stride[0])
    for i in range(1, len(num_chann)):
        L = math.floor(1 + (L + 2 * pad[i] - dial[i] * (ker_size[i] - 1) - 1) / stride[i])
    L = int(L)

    params = {"conv": [], "lin": []}
    keys = list(jax.random.split(key, 2 * (len(num_chann) + len(num_hidden))))
    ki = 0

    in_ch = 1
    for i, out_ch in enumerate(num_chann):
        fan_in = in_ch * ker_size[i]
        bound = 1.0 / math.sqrt(fan_in)
        w = jax.random.uniform(keys[ki], (out_ch, in_ch, ker_size[i]),
                               minval=-bound, maxval=bound, dtype=jnp.float32)
        b = jax.random.uniform(keys[ki + 1], (out_ch,),
                               minval=-bound, maxval=bound, dtype=jnp.float32)
        ki += 2
        params["conv"].append((w, b, jnp.ones((out_ch,), jnp.float32),
                               jnp.zeros((out_ch,), jnp.float32)))
        in_ch = out_ch

    in_f = num_chann[-1] * L
    for h in num_hidden:
        bound = 1.0 / math.sqrt(in_f)
        w = jax.random.uniform(keys[ki], (h, in_f),
                               minval=-bound, maxval=bound, dtype=jnp.float32)
        b = jax.random.uniform(keys[ki + 1], (h,),
                               minval=-bound, maxval=bound, dtype=jnp.float32)
        ki += 2
        params["lin"].append((w, b, jnp.ones((h,), jnp.float32),
                              jnp.zeros((h,), jnp.float32)))
        in_f = h

    cfg = dict(num_chann=num_chann, ker_size=ker_size, stride=stride,
               dial=dial, pad=pad, num_hidden=num_hidden, L=L)
    return cfg, params


if __name__ == "__main__":
    # Small, module-consistent shapes:
    #   batch=4, in-channels=1, nbeats=64; num_chann=[16,16,8], k=4, stride=2,
    #   num_hidden=[32,32]  ->  output (4, 32)
    nbeats = 64
    batch = 4
    key = jax.random.PRNGKey(0)
    k_x, k_p = jax.random.split(key)

    cfg, params = build_config_and_params(
        nbeats=nbeats, num_chann=[16, 16, 8], ker_size=4, stride=2,
        dial=1, pad=0, num_hidden=[32, 32], key=k_p)

    x = jax.random.normal(k_x, (batch, 1, nbeats), dtype=jnp.float32)

    operands, meta, n0_pad, hout_pad = pack_advrtset(params, cfg, nbeats)
    out = advrtset_forward(x, operands, meta, n0_pad, hout_pad)
    out = jax.block_until_ready(out)

    # numerical sanity check against a faithful pure-JAX reference that mirrors
    # the bf16 matmul-operand choice (so the expected mismatch is ~1e-5).  The
    # tolerance leaves headroom for the f32 MXU precision mode on the tiny
    # BN-statistics matmuls; genuine layout/BN bugs would show up as O(1) errors.
    ref = jax.block_until_ready(advrtset_reference(x, params, cfg))
    assert out.shape == (batch, cfg["num_hidden"][-1])
    np.testing.assert_allclose(np.asarray(out), np.asarray(ref), rtol=2e-2, atol=2e-2)

    print("KERNEL_OK")
</pallas_src>

<mosaic_0001>
module attributes {stable_mosaic.version = 11 : i64} {
  func.func @kernel(%arg0: memref<8x128xf32, #tpu.memory_space<vmem>>, %arg1: memref<128x512xbf16, #tpu.memory_space<vmem>>, %arg2: memref<512x16xf32, #tpu.memory_space<vmem>>, %arg3: memref<16x512xf32, #tpu.memory_space<vmem>>, %arg4: memref<2x16xf32, #tpu.memory_space<vmem>>, %arg5: memref<512x256xbf16, #tpu.memory_space<vmem>>, %arg6: memref<256x16xf32, #tpu.memory_space<vmem>>, %arg7: memref<16x256xf32, #tpu.memory_space<vmem>>, %arg8: memref<2x16xf32, #tpu.memory_space<vmem>>, %arg9: memref<256x128xbf16, #tpu.memory_space<vmem>>, %arg10: memref<128x8xf32, #tpu.memory_space<vmem>>, %arg11: memref<8x128xf32, #tpu.memory_space<vmem>>, %arg12: memref<2x8xf32, #tpu.memory_space<vmem>>, %arg13: memref<128x128xbf16, #tpu.memory_space<vmem>>, %arg14: memref<2x128xf32, #tpu.memory_space<vmem>>, %arg15: memref<128x128xbf16, #tpu.memory_space<vmem>>, %arg16: memref<2x128xf32, #tpu.memory_space<vmem>>, %arg17: memref<8x128xf32, #tpu.memory_space<vmem>>) attributes {dimension_semantics = [], scalar_prefetch = 0 : i64, scratch_operands = 0 : i64, tpu.core_type = #tpu.core_type<tc>} {
    %c0 = arith.constant 0 : index
    %c0_0 = arith.constant 0 : index
    %0 = vector.load %arg0[%c0, %c0_0] : memref<8x128xf32, #tpu.memory_space<vmem>>, vector<8x128xf32>
    %1 = tpu.iota {dimensions = array<i32: 0>} : vector<8x1xi32>
    %c4_i32 = arith.constant 4 : i32
    %2 = vector.broadcast %c4_i32 : i32 to vector<8x1xi32>
    %3 = arith.cmpi slt, %1, %2 : vector<8x1xi32>
    %4 = arith.extui %3 : vector<8x1xi1> to vector<8x1xi32>
    %5 = arith.sitofp %4 : vector<8x1xi32> to vector<8x1xf32>
    %6 = arith.truncf %0 : vector<8x128xf32> to vector<8x128xbf16>
    %c0_1 = arith.constant 0 : index
    %c0_2 = arith.constant 0 : index
    %7 = vector.load %arg1[%c0_1, %c0_2] : memref<128x512xbf16, #tpu.memory_space<vmem>>, vector<128x512xbf16>
    %cst = arith.constant dense<0.000000e+00> : vector<8x512xf32>
    %8 = tpu.matmul %6, %7, %cst {dimension_numbers = #tpu.dot_dimension_numbers<[1], [0], [0], [1], [0, 0, 1, 1], [], []>} : vector<8x128xbf16>, vector<128x512xbf16>, vector<8x512xf32> -> vector<8x512xf32>
    %cst_3 = arith.constant dense<0.000000e+00> : vector<512xf32>
    %9 = vector.multi_reduction <add>, %8, %cst_3 [0] : vector<8x512xf32> to vector<512xf32>
    %10 = vector.shape_cast %9 : vector<512xf32> to vector<1x512xf32>
    %11 = arith.mulf %8, %8 : vector<8x512xf32>
    %cst_4 = arith.constant dense<0.000000e+00> : vector<512xf32>
    %12 = vector.multi_reduction <add>, %11, %cst_4 [0] : vector<8x512xf32> to vector<512xf32>
    %13 = vector.shape_cast %12 : vector<512xf32> to vector<1x512xf32>
    %14 = tpu.concatenate %10, %13 in 0 : vector<1x512xf32>, vector<1x512xf32> -> vector<2x512xf32>
    %c0_5 = arith.constant 0 : index
    %c0_6 = arith.constant 0 : index
    %15 = vector.load %arg2[%c0_5, %c0_6] : memref<512x16xf32, #tpu.memory_space<vmem>>, vector<512x16xf32>
    %cst_7 = arith.constant dense<0.000000e+00> : vector<2x16xf32>
    %16 = tpu.matmul %14, %15, %cst_7 {dimension_numbers = #tpu.dot_dimension_numbers<[1], [0], [0], [1], [0, 0, 1, 1], [], []>} : vector<2x512xf32>, vector<512x16xf32>, vector<2x16xf32> -> vector<2x16xf32>
    %17 = vector.extract_strided_slice %16 {offsets = [0, 0], sizes = [1, 16], strides = [1, 1]} : vector<2x16xf32> to vector<1x16xf32>
    %cst_8 = arith.constant 0.00806451589 : f32
    %18 = vector.broadcast %cst_8 : f32 to vector<1x16xf32>
    %19 = arith.mulf %17, %18 : vector<1x16xf32>
    %20 = vector.extract_strided_slice %16 {offsets = [1, 0], sizes = [1, 16], strides = [1, 1]} : vector<2x16xf32> to vector<1x16xf32>
    %cst_9 = arith.constant 0.00806451589 : f32
    %21 = vector.broadcast %cst_9 : f32 to vector<1x16xf32>
    %22 = arith.mulf %20, %21 : vector<1x16xf32>
    %23 = arith.mulf %19, %19 : vector<1x16xf32>
    %24 = arith.subf %22, %23 : vector<1x16xf32>
    %cst_10 = arith.constant 0.000000e+00 : f32
    %25 = vector.broadcast %cst_10 : f32 to vector<1x16xf32>
    %26 = arith.maximumf %24, %25 : vector<1x16xf32>
    %cst_11 = arith.constant 9.99999974E-6 : f32
    %27 = vector.broadcast %cst_11 : f32 to vector<1x16xf32>
    %28 = arith.addf %26, %27 : vector<1x16xf32>
    %29 = math.rsqrt %28 : vector<1x16xf32>
    %c0_12 = arith.constant 0 : index
    %c0_13 = arith.constant 0 : index
    %30 = vector.load %arg4[%c0_12, %c0_13] : memref<2x16xf32, #tpu.memory_space<vmem>>, vector<2x16xf32>
    %31 = vector.extract_strided_slice %30 {offsets = [0, 0], sizes = [1, 16], strides = [1, 1]} : vector<2x16xf32> to vector<1x16xf32>
    %32 = arith.mulf %31, %29 : vector<1x16xf32>
    %33 = vector.extract_strided_slice %30 {offsets = [1, 0], sizes = [1, 16], strides = [1, 1]} : vector<2x16xf32> to vector<1x16xf32>
    %34 = arith.mulf %19, %32 : vector<1x16xf32>
    %35 = arith.subf %33, %34 : vector<1x16xf32>
    %36 = tpu.concatenate %32, %35 in 0 : vector<1x16xf32>, vector<1x16xf32> -> vector<2x16xf32>
    %c0_14 = arith.constant 0 : index
    %c0_15 = arith.constant 0 : index
    %37 = vector.load %arg3[%c0_14, %c0_15] : memref<16x512xf32, #tpu.memory_space<vmem>>, vector<16x512xf32>
    %cst_16 = arith.constant dense<0.000000e+00> : vector<2x512xf32>
    %38 = tpu.matmul %36, %37, %cst_16 {dimension_numbers = #tpu.dot_dimension_numbers<[1], [0], [0], [1], [0, 0, 1, 1], [], []>} : vector<2x16xf32>, vector<16x512xf32>, vector<2x512xf32> -> vector<2x512xf32>
    %39 = vector.extract_strided_slice %38 {offsets = [0, 0], sizes = [1, 512], strides = [1, 1]} : vector<2x512xf32> to vector<1x512xf32>
    %40 = vector.broadcast %39 : vector<1x512xf32> to vector<8x512xf32>
    %41 = arith.mulf %8, %40 : vector<8x512xf32>
    %42 = vector.extract_strided_slice %38 {offsets = [1, 0], sizes = [1, 512], strides = [1, 1]} : vector<2x512xf32> to vector<1x512xf32>
    %43 = vector.broadcast %42 : vector<1x512xf32> to vector<8x512xf32>
    %44 = arith.addf %41, %43 : vector<8x512xf32>
    %cst_17 = arith.constant 0.000000e+00 : f32
    %45 = vector.broadcast %cst_17 : f32 to vector<8x512xf32>
    %46 = arith.maximumf %44, %45 : vector<8x512xf32>
    %47 = vector.broadcast %5 : vector<8x1xf32> to vector<8x512xf32>
    %48 = arith.mulf %46, %47 : vector<8x512xf32>
    %49 = arith.truncf %48 : vector<8x512xf32> to vector<8x512xbf16>
    %c0_18 = arith.constant 0 : index
    %c0_19 = arith.constant 0 : index
    %50 = vector.load %arg5[%c0_18, %c0_19] : memref<512x256xbf16, #tpu.memory_space<vmem>>, vector<512x256xbf16>
    %cst_20 = arith.constant dense<0.000000e+00> : vector<8x256xf32>
    %51 = tpu.matmul %49, %50, %cst_20 {dimension_numbers = #tpu.dot_dimension_numbers<[1], [0], [0], [1], [0, 0, 1, 1], [], []>} : vector<8x512xbf16>, vector<512x256xbf16>, vector<8x256xf32> -> vector<8x256xf32>
    %cst_21 = arith.constant dense<0.000000e+00> : vector<256xf32>
    %52 = vector.multi_reduction <add>, %51, %cst_21 [0] : vector<8x256xf32> to vector<256xf32>
    %53 = vector.shape_cast %52 : vector<256xf32> to vector<1x256xf32>
    %54 = arith.mulf %51, %51 : vector<8x256xf32>
    %cst_22 = arith.constant dense<0.000000e+00> : vector<256xf32>
    %55 = vector.multi_reduction <add>, %54, %cst_22 [0] : vector<8x256xf32> to vector<256xf32>
    %56 = vector.shape_cast %55 : vector<256xf32> to vector<1x256xf32>
    %57 = tpu.concatenate %53, %56 in 0 : vector<1x256xf32>, vector<1x256xf32> -> vector<2x256xf32>
    %c0_23 = arith.constant 0 : index
    %c0_24 = arith.constant 0 : index
    %58 = vector.load %arg6[%c0_23, %c0_24] : memref<256x16xf32, #tpu.memory_space<vmem>>, vector<256x16xf32>
    %cst_25 = arith.constant dense<0.000000e+00> : vector<2x16xf32>
    %59 = tpu.matmul %57, %58, %cst_25 {dimension_numbers = #tpu.dot_dimension_numbers<[1], [0], [0], [1], [0, 0, 1, 1], [], []>} : vector<2x256xf32>, vector<256x16xf32>, vector<2x16xf32> -> vector<2x16xf32>
    %60 = vector.extract_strided_slice %59 {offsets = [0, 0], sizes = [1, 16], strides = [1, 1]} : vector<2x16xf32> to vector<1x16xf32>
    %cst_26 = arith.constant 0.0178571437 : f32
    %61 = vector.broadcast %cst_26 : f32 to vector<1x16xf32>
    %62 = arith.mulf %60, %61 : vector<1x16xf32>
    %63 = vector.extract_strided_slice %59 {offsets = [1, 0], sizes = [1, 16], strides = [1, 1]} : vector<2x16xf32> to vector<1x16xf32>
    %cst_27 = arith.constant 0.0178571437 : f32
    %64 = vector.broadcast %cst_27 : f32 to vector<1x16xf32>
    %65 = arith.mulf %63, %64 : vector<1x16xf32>
    %66 = arith.mulf %62, %62 : vector<1x16xf32>
    %67 = arith.subf %65, %66 : vector<1x16xf32>
    %cst_28 = arith.constant 0.000000e+00 : f32
    %68 = vector.broadcast %cst_28 : f32 to vector<1x16xf32>
    %69 = arith.maximumf %67, %68 : vector<1x16xf32>
    %cst_29 = arith.constant 9.99999974E-6 : f32
    %70 = vector.broadcast %cst_29 : f32 to vector<1x16xf32>
    %71 = arith.addf %69, %70 : vector<1x16xf32>
    %72 = math.rsqrt %71 : vector<1x16xf32>
    %c0_30 = arith.constant 0 : index
    %c0_31 = arith.constant 0 : index
    %73 = vector.load %arg8[%c0_30, %c0_31] : memref<2x16xf32, #tpu.memory_space<vmem>>, vector<2x16xf32>
    %74 = vector.extract_strided_slice %73 {offsets = [0, 0], sizes = [1, 16], strides = [1, 1]} : vector<2x16xf32> to vector<1x16xf32>
    %75 = arith.mulf %74, %72 : vector<1x16xf32>
    %76 = vector.extract_strided_slice %73 {offsets = [1, 0], sizes = [1, 16], strides = [1, 1]} : vector<2x16xf32> to vector<1x16xf32>
    %77 = arith.mulf %62, %75 : vector<1x16xf32>
    %78 = arith.subf %76, %77 : vector<1x16xf32>
    %79 = tpu.concatenate %75, %78 in 0 : vector<1x16xf32>, vector<1x16xf32> -> vector<2x16xf32>
    %c0_32 = arith.constant 0 : index
    %c0_33 = arith.constant 0 : index
    %80 = vector.load %arg7[%c0_32, %c0_33] : memref<16x256xf32, #tpu.memory_space<vmem>>, vector<16x256xf32>
    %cst_34 = arith.constant dense<0.000000e+00> : vector<2x256xf32>
    %81 = tpu.matmul %79, %80, %cst_34 {dimension_numbers = #tpu.dot_dimension_numbers<[1], [0], [0], [1], [0, 0, 1, 1], [], []>} : vector<2x16xf32>, vector<16x256xf32>, vector<2x256xf32> -> vector<2x256xf32>
    %82 = vector.extract_strided_slice %81 {offsets = [0, 0], sizes = [1, 256], strides = [1, 1]} : vector<2x256xf32> to vector<1x256xf32>
    %83 = vector.broadcast %82 : vector<1x256xf32> to vector<8x256xf32>
    %84 = arith.mulf %51, %83 : vector<8x256xf32>
    %85 = vector.extract_strided_slice %81 {offsets = [1, 0], sizes = [1, 256], strides = [1, 1]} : vector<2x256xf32> to vector<1x256xf32>
    %86 = vector.broadcast %85 : vector<1x256xf32> to vector<8x256xf32>
    %87 = arith.addf %84, %86 : vector<8x256xf32>
    %cst_35 = arith.constant 0.000000e+00 : f32
    %88 = vector.broadcast %cst_35 : f32 to vector<8x256xf32>
    %89 = arith.maximumf %87, %88 : vector<8x256xf32>
    %90 = vector.broadcast %5 : vector<8x1xf32> to vector<8x256xf32>
    %91 = arith.mulf %89, %90 : vector<8x256xf32>
    %92 = arith.truncf %91 : vector<8x256xf32> to vector<8x256xbf16>
    %c0_36 = arith.constant 0 : index
    %c0_37 = arith.constant 0 : index
    %93 = vector.load %arg9[%c0_36, %c0_37] : memref<256x128xbf16, #tpu.memory_space<vmem>>, vector<256x128xbf16>
    %cst_38 = arith.constant dense<0.000000e+00> : vector<8x128xf32>
    %94 = tpu.matmul %92, %93, %cst_38 {dimension_numbers = #tpu.dot_dimension_numbers<[1], [0], [0], [1], [0, 0, 1, 1], [], []>} : vector<8x256xbf16>, vector<256x128xbf16>, vector<8x128xf32> -> vector<8x128xf32>
    %cst_39 = arith.constant dense<0.000000e+00> : vector<128xf32>
    %95 = vector.multi_reduction <add>, %94, %cst_39 [0] : vector<8x128xf32> to vector<128xf32>
    %96 = vector.shape_cast %95 : vector<128xf32> to vector<1x128xf32>
    %97 = arith.mulf %94, %94 : vector<8x128xf32>
    %cst_40 = arith.constant dense<0.000000e+00> : vector<128xf32>
    %98 = vector.multi_reduction <add>, %97, %cst_40 [0] : vector<8x128xf32> to vector<128xf32>
    %99 = vector.shape_cast %98 : vector<128xf32> to vector<1x128xf32>
    %100 = tpu.concatenate %96, %99 in 0 : vector<1x128xf32>, vector<1x128xf32> -> vector<2x128xf32>
    %c0_41 = arith.constant 0 : index
    %c0_42 = arith.constant 0 : index
    %101 = vector.load %arg10[%c0_41, %c0_42] : memref<128x8xf32, #tpu.memory_space<vmem>>, vector<128x8xf32>
    %cst_43 = arith.constant dense<0.000000e+00> : vector<2x8xf32>
    %102 = tpu.matmul %100, %101, %cst_43 {dimension_numbers = #tpu.dot_dimension_numbers<[1], [0], [0], [1], [0, 0, 1, 1], [], []>} : vector<2x128xf32>, vector<128x8xf32>, vector<2x8xf32> -> vector<2x8xf32>
    %103 = vector.extract_strided_slice %102 {offsets = [0, 0], sizes = [1, 8], strides = [1, 1]} : vector<2x8xf32> to vector<1x8xf32>
    %cst_44 = arith.constant 0.0416666679 : f32
    %104 = vector.broadcast %cst_44 : f32 to vector<1x8xf32>
    %105 = arith.mulf %103, %104 : vector<1x8xf32>
    %106 = vector.extract_strided_slice %102 {offsets = [1, 0], sizes = [1, 8], strides = [1, 1]} : vector<2x8xf32> to vector<1x8xf32>
    %cst_45 = arith.constant 0.0416666679 : f32
    %107 = vector.broadcast %cst_45 : f32 to vector<1x8xf32>
    %108 = arith.mulf %106, %107 : vector<1x8xf32>
    %109 = arith.mulf %105, %105 : vector<1x8xf32>
    %110 = arith.subf %108, %109 : vector<1x8xf32>
    %cst_46 = arith.constant 0.000000e+00 : f32
    %111 = vector.broadcast %cst_46 : f32 to vector<1x8xf32>
    %112 = arith.maximumf %110, %111 : vector<1x8xf32>
    %cst_47 = arith.constant 9.99999974E-6 : f32
    %113 = vector.broadcast %cst_47 : f32 to vector<1x8xf32>
    %114 = arith.addf %112, %113 : vector<1x8xf32>
    %115 = math.rsqrt %114 : vector<1x8xf32>
    %c0_48 = arith.constant 0 : index
    %c0_49 = arith.constant 0 : index
    %116 = vector.load %arg12[%c0_48, %c0_49] : memref<2x8xf32, #tpu.memory_space<vmem>>, vector<2x8xf32>
    %117 = vector.extract_strided_slice %116 {offsets = [0, 0], sizes = [1, 8], strides = [1, 1]} : vector<2x8xf32> to vector<1x8xf32>
    %118 = arith.mulf %117, %115 : vector<1x8xf32>
    %119 = vector.extract_strided_slice %116 {offsets = [1, 0], sizes = [1, 8], strides = [1, 1]} : vector<2x8xf32> to vector<1x8xf32>
    %120 = arith.mulf %105, %118 : vector<1x8xf32>
    %121 = arith.subf %119, %120 : vector<1x8xf32>
    %122 = tpu.concatenate %118, %121 in 0 : vector<1x8xf32>, vector<1x8xf32> -> vector<2x8xf32>
    %c0_50 = arith.constant 0 : index
    %c0_51 = arith.constant 0 : index
    %123 = vector.load %arg11[%c0_50, %c0_51] : memref<8x128xf32, #tpu.memory_space<vmem>>, vector<8x128xf32>
    %cst_52 = arith.constant dense<0.000000e+00> : vector<2x128xf32>
    %124 = tpu.matmul %122, %123, %cst_52 {dimension_numbers = #tpu.dot_dimension_numbers<[1], [0], [0], [1], [0, 0, 1, 1], [], []>} : vector<2x8xf32>, vector<8x128xf32>, vector<2x128xf32> -> vector<2x128xf32>
    %125 = vector.extract_strided_slice %124 {offsets = [0, 0], sizes = [1, 128], strides = [1, 1]} : vector<2x128xf32> to vector<1x128xf32>
    %126 = vector.broadcast %125 : vector<1x128xf32> to vector<8x128xf32>
    %127 = arith.mulf %94, %126 : vector<8x128xf32>
    %128 = vector.extract_strided_slice %124 {offsets = [1, 0], sizes = [1, 128], strides = [1, 1]} : vector<2x128xf32> to vector<1x128xf32>
    %129 = vector.broadcast %128 : vector<1x128xf32> to vector<8x128xf32>
    %130 = arith.addf %127, %129 : vector<8x128xf32>
    %cst_53 = arith.constant 0.000000e+00 : f32
    %131 = vector.broadcast %cst_53 : f32 to vector<8x128xf32>
    %132 = arith.maximumf %130, %131 : vector<8x128xf32>
    %133 = vector.broadcast %5 : vector<8x1xf32> to vector<8x128xf32>
    %134 = arith.mulf %132, %133 : vector<8x128xf32>
    %135 = arith.truncf %134 : vector<8x128xf32> to vector<8x128xbf16>
    %c0_54 = arith.constant 0 : index
    %c0_55 = arith.constant 0 : index
    %136 = vector.load %arg13[%c0_54, %c0_55] : memref<128x128xbf16, #tpu.memory_space<vmem>>, vector<128x128xbf16>
    %cst_56 = arith.constant dense<0.000000e+00> : vector<8x128xf32>
    %137 = tpu.matmul %135, %136, %cst_56 {dimension_numbers = #tpu.dot_dimension_numbers<[1], [0], [0], [1], [0, 0, 1, 1], [], []>} : vector<8x128xbf16>, vector<128x128xbf16>, vector<8x128xf32> -> vector<8x128xf32>
    %cst_57 = arith.constant dense<0.000000e+00> : vector<128xf32>
    %138 = vector.multi_reduction <add>, %137, %cst_57 [0] : vector<8x128xf32> to vector<128xf32>
    %139 = vector.shape_cast %138 : vector<128xf32> to vector<1x128xf32>
    %140 = arith.mulf %137, %137 : vector<8x128xf32>
    %cst_58 = arith.constant dense<0.000000e+00> : vector<128xf32>
    %141 = vector.multi_reduction <add>, %140, %cst_58 [0] : vector<8x128xf32> to vector<128xf32>
    %142 = vector.shape_cast %141 : vector<128xf32> to vector<1x128xf32>
    %143 = tpu.concatenate %139, %142 in 0 : vector<1x128xf32>, vector<1x128xf32> -> vector<2x128xf32>
    %144 = vector.extract_strided_slice %143 {offsets = [0, 0], sizes = [1, 128], strides = [1, 1]} : vector<2x128xf32> to vector<1x128xf32>
    %cst_59 = arith.constant 2.500000e-01 : f32
    %145 = vector.broadcast %cst_59 : f32 to vector<1x128xf32>
    %146 = arith.mulf %144, %145 : vector<1x128xf32>
    %147 = vector.extract_strided_slice %143 {offsets = [1, 0], sizes = [1, 128], strides = [1, 1]} : vector<2x128xf32> to vector<1x128xf32>
    %cst_60 = arith.constant 2.500000e-01 : f32
    %148 = vector.broadcast %cst_60 : f32 to vector<1x128xf32>
    %149 = arith.mulf %147, %148 : vector<1x128xf32>
    %150 = arith.mulf %146, %146 : vector<1x128xf32>
    %151 = arith.subf %149, %150 : vector<1x128xf32>
    %cst_61 = arith.constant 0.000000e+00 : f32
    %152 = vector.broadcast %cst_61 : f32 to vector<1x128xf32>
    %153 = arith.maximumf %151, %152 : vector<1x128xf32>
    %cst_62 = arith.constant 9.99999974E-6 : f32
    %154 = vector.broadcast %cst_62 : f32 to vector<1x128xf32>
    %155 = arith.addf %153, %154 : vector<1x128xf32>
    %156 = math.rsqrt %155 : vector<1x128xf32>
    %c0_63 = arith.constant 0 : index
    %c0_64 = arith.constant 0 : index
    %157 = vector.load %arg14[%c0_63, %c0_64] : memref<2x128xf32, #tpu.memory_space<vmem>>, vector<2x128xf32>
    %158 = vector.extract_strided_slice %157 {offsets = [0, 0], sizes = [1, 128], strides = [1, 1]} : vector<2x128xf32> to vector<1x128xf32>
    %159 = arith.mulf %158, %156 : vector<1x128xf32>
    %160 = vector.extract_strided_slice %157 {offsets = [1, 0], sizes = [1, 128], strides = [1, 1]} : vector<2x128xf32> to vector<1x128xf32>
    %161 = arith.mulf %146, %159 : vector<1x128xf32>
    %162 = arith.subf %160, %161 : vector<1x128xf32>
    %163 = tpu.concatenate %159, %162 in 0 : vector<1x128xf32>, vector<1x128xf32> -> vector<2x128xf32>
    %164 = vector.extract_strided_slice %163 {offsets = [0, 0], sizes = [1, 128], strides = [1, 1]} : vector<2x128xf32> to vector<1x128xf32>
    %165 = vector.broadcast %164 : vector<1x128xf32> to vector<8x128xf32>
    %166 = arith.mulf %137, %165 : vector<8x128xf32>
    %167 = vector.extract_strided_slice %163 {offsets = [1, 0], sizes = [1, 128], strides = [1, 1]} : vector<2x128xf32> to vector<1x128xf32>
    %168 = vector.broadcast %167 : vector<1x128xf32> to vector<8x128xf32>
    %169 = arith.addf %166, %168 : vector<8x128xf32>
    %cst_65 = arith.constant 0.000000e+00 : f32
    %170 = vector.broadcast %cst_65 : f32 to vector<8x128xf32>
    %171 = arith.maximumf %169, %170 : vector<8x128xf32>
    %172 = vector.broadcast %5 : vector<8x1xf32> to vector<8x128xf32>
    %173 = arith.mulf %171, %172 : vector<8x128xf32>
    %174 = arith.truncf %173 : vector<8x128xf32> to vector<8x128xbf16>
    %c0_66 = arith.constant 0 : index
    %c0_67 = arith.constant 0 : index
    %175 = vector.load %arg15[%c0_66, %c0_67] : memref<128x128xbf16, #tpu.memory_space<vmem>>, vector<128x128xbf16>
    %cst_68 = arith.constant dense<0.000000e+00> : vector<8x128xf32>
    %176 = tpu.matmul %174, %175, %cst_68 {dimension_numbers = #tpu.dot_dimension_numbers<[1], [0], [0], [1], [0, 0, 1, 1], [], []>} : vector<8x128xbf16>, vector<128x128xbf16>, vector<8x128xf32> -> vector<8x128xf32>
    %cst_69 = arith.constant dense<0.000000e+00> : vector<128xf32>
    %177 = vector.multi_reduction <add>, %176, %cst_69 [0] : vector<8x128xf32> to vector<128xf32>
    %178 = vector.shape_cast %177 : vector<128xf32> to vector<1x128xf32>
    %179 = arith.mulf %176, %176 : vector<8x128xf32>
    %cst_70 = arith.constant dense<0.000000e+00> : vector<128xf32>
    %180 = vector.multi_reduction <add>, %179, %cst_70 [0] : vector<8x128xf32> to vector<128xf32>
    %181 = vector.shape_cast %180 : vector<128xf32> to vector<1x128xf32>
    %182 = tpu.concatenate %178, %181 in 0 : vector<1x128xf32>, vector<1x128xf32> -> vector<2x128xf32>
    %183 = vector.extract_strided_slice %182 {offsets = [0, 0], sizes = [1, 128], strides = [1, 1]} : vector<2x128xf32> to vector<1x128xf32>
    %cst_71 = arith.constant 2.500000e-01 : f32
    %184 = vector.broadcast %cst_71 : f32 to vector<1x128xf32>
    %185 = arith.mulf %183, %184 : vector<1x128xf32>
    %186 = vector.extract_strided_slice %182 {offsets = [1, 0], sizes = [1, 128], strides = [1, 1]} : vector<2x128xf32> to vector<1x128xf32>
    %cst_72 = arith.constant 2.500000e-01 : f32
    %187 = vector.broadcast %cst_72 : f32 to vector<1x128xf32>
    %188 = arith.mulf %186, %187 : vector<1x128xf32>
    %189 = arith.mulf %185, %185 : vector<1x128xf32>
    %190 = arith.subf %188, %189 : vector<1x128xf32>
    %cst_73 = arith.constant 0.000000e+00 : f32
    %191 = vector.broadcast %cst_73 : f32 to vector<1x128xf32>
    %192 = arith.maximumf %190, %191 : vector<1x128xf32>
    %cst_74 = arith.constant 9.99999974E-6 : f32
    %193 = vector.broadcast %cst_74 : f32 to vector<1x128xf32>
    %194 = arith.addf %192, %193 : vector<1x128xf32>
    %195 = math.rsqrt %194 : vector<1x128xf32>
    %c0_75 = arith.constant 0 : index
    %c0_76 = arith.constant 0 : index
    %196 = vector.load %arg16[%c0_75, %c0_76] : memref<2x128xf32, #tpu.memory_space<vmem>>, vector<2x128xf32>
    %197 = vector.extract_strided_slice %196 {offsets = [0, 0], sizes = [1, 128], strides = [1, 1]} : vector<2x128xf32> to vector<1x128xf32>
    %198 = arith.mulf %197, %195 : vector<1x128xf32>
    %199 = vector.extract_strided_slice %196 {offsets = [1, 0], sizes = [1, 128], strides = [1, 1]} : vector<2x128xf32> to vector<1x128xf32>
    %200 = arith.mulf %185, %198 : vector<1x128xf32>
    %201 = arith.subf %199, %200 : vector<1x128xf32>
    %202 = tpu.concatenate %198, %201 in 0 : vector<1x128xf32>, vector<1x128xf32> -> vector<2x128xf32>
    %203 = vector.extract_strided_slice %202 {offsets = [0, 0], sizes = [1, 128], strides = [1, 1]} : vector<2x128xf32> to vector<1x128xf32>
    %204 = vector.broadcast %203 : vector<1x128xf32> to vector<8x128xf32>
    %205 = arith.mulf %176, %204 : vector<8x128xf32>
    %206 = vector.extract_strided_slice %202 {offsets = [1, 0], sizes = [1, 128], strides = [1, 1]} : vector<2x128xf32> to vector<1x128xf32>
    %207 = vector.broadcast %206 : vector<1x128xf32> to vector<8x128xf32>
    %208 = arith.addf %205, %207 : vector<8x128xf32>
    %cst_77 = arith.constant 0.000000e+00 : f32
    %209 = vector.broadcast %cst_77 : f32 to vector<8x128xf32>
    %210 = arith.maximumf %208, %209 : vector<8x128xf32>
    %211 = vector.broadcast %5 : vector<8x1xf32> to vector<8x128xf32>
    %212 = arith.mulf %210, %211 : vector<8x128xf32>
    %c0_78 = arith.constant 0 : index
    %c0_79 = arith.constant 0 : index
    %213 = vector.load %arg17[%c0_78, %c0_79] : memref<8x128xf32, #tpu.memory_space<vmem>>, vector<8x128xf32>
    tpu.vector_store %arg17[%c0_78, %c0_79], %212 {strides = array<i32>} : memref<8x128xf32, #tpu.memory_space<vmem>>, vector<8x128xf32>,
    return
  }
}

</mosaic_0001>

<bundles_post_ra>
// kernel: tpu_custom_call.1
= control target key start
LH: loop header
LB: loop body
LE: loop exit
PB: predicated region body
PF: predicated region fallthrough
CT: control target
= control target key end

     0   :  { %s4028_s0 = inlined_call_operand.vmem [shape: f32[8,128], index: 0, kind: input, shape index: {}]   ;;  %s4029_s1 = inlined_call_operand.vmem [shape: bf16[128,512], index: 1, kind: input, shape index: {}]   ;;  %s4030_s2 = inlined_call_operand.vmem [shape: f32[512,16], index: 2, kind: input, shape index: {}]   ;;  %s4031_s3 = inlined_call_operand.vmem [shape: f32[16,512], index: 3, kind: input, shape index: {}]   ;;  %s4032_s4 = inlined_call_operand.hbm [shape: f32[2,16], index: 4, kind: input, shape index: {}]   ;;  %s4033_s5 = inlined_call_operand.vmem [shape: bf16[512,256], index: 5, kind: input, shape index: {}]   ;;  %s4034_s6 = inlined_call_operand.vmem [shape: f32[256,16], index: 6, kind: input, shape index: {}]   ;;  %s4035_s7 = inlined_call_operand.hbm [shape: f32[16,256], index: 7, kind: input, shape index: {}]   ;;  %s4036_s8 = inlined_call_operand.hbm [shape: f32[2,16], index: 8, kind: input, shape index: {}]   ;;  %s4037_s9 = inlined_call_operand.vmem [shape: bf16[256,128], index: 9, kind: input, shape index: {}]   ;;  %s4038_s10 = inlined_call_operand.vmem [shape: f32[128,8], index: 10, kind: input, shape index: {}]   ;;  %s4039_s11 = inlined_call_operand.vmem [shape: f32[8,128], index: 11, kind: input, shape index: {}]   ;;  %s4040_s12 = inlined_call_operand.vmem [shape: f32[2,8], index: 12, kind: input, shape index: {}]   ;;  %s4041_s13 = inlined_call_operand.hbm [shape: bf16[128,128], index: 13, kind: input, shape index: {}]   ;;  %s4042_s14 = inlined_call_operand.vmem [shape: f32[2,128], index: 14, kind: input, shape index: {}]   ;;  %s4043_s15 = inlined_call_operand.hbm [shape: bf16[128,128], index: 15, kind: input, shape index: {}]   ;;  %s4044_s16 = inlined_call_operand.hbm [shape: f32[2,128], index: 16, kind: input, shape index: {}]   ;;  %s4045_s17 = inlined_call_operand.hbm [shape: f32[8,128], index: 17, kind: output, shape index: {}]  }
   0x1   :  { %4047 = sst [smem:[#allocation19_spill]] %s4028_s0 }
   0x2   :  { %4048 = sst [smem:[#allocation20_spill]] %s4029_s1 }
   0x3   :  { %22 = vsyncpa [#allocation3], 0 }
   0x4   :  { %23 = vsyncpa [#allocation6], 0 }
   0x5   :  { %24 = vsyncpa [#allocation9], 0 }
   0x6   :  { %25 = vsyncpa [#allocation12], 0 }
   0x7   :  { %26 = vsyncpa [#allocation4], 0  ;;  %s3045_s24 = smov [#allocation5]  }
   0x8   :  { %s54_s25 = sshll.u32 %s3045_s24, 4  ;;  %s55_s25 = int_to_ptr.vmem [resolvable:$true] %s54_s25 }
   0x9   :  { %s2903_s26 = scalar_lea.vmem %s55_s25, 512  ;;  %p2908_p1 = scmp.lt.s32.totalorder %s55_s25, %s55_s25 }
   0xa   :  { %p2904_p0 = scmp.ne.s32.totalorder %s55_s25, %s2903_s26  ;;  %p2909_p2 = scmp.lt.s32.totalorder %s2903_s26, %s2903_s26 }
   0xc   :  { %p2910_p3 = por %p2909_p2, %p2908_p1 }
   0xe   :  { %p2911_p4 = pnand %p2910_p3, %p2904_p0 }
  0x10   :  { %2914 = shalt.err (!%p2911_p4)
}
  0x11   :  { %s3046_s27 = smov 256   ;;  %s3047_s28 = smov 16  }
  0x12   :  { %60 = dma.hbm_to_vmem [thread:$0]  %s4035_s7, 512, %s55_s25, [#allocation6], %s3046_s27, %s3046_s27, %s3047_s28  }
  0x13   :  { %s3048_s30 = smov [#allocation8]  }
  0x14   :  { %s84_s18 = sshll.u32 %s3048_s30, 4  ;;  %s85_s18 = int_to_ptr.vmem [resolvable:$true] %s84_s18 }
  0x15   :  { %s2923_s19 = scalar_lea.vmem %s85_s18, 1024  ;;  %p2928_p6 = scmp.lt.s32.totalorder %s85_s18, %s85_s18 }
  0x16   :  { %p2924_p5 = scmp.ne.s32.totalorder %s85_s18, %s2923_s19  ;;  %p2929_p7 = scmp.lt.s32.totalorder %s2923_s19, %s2923_s19 }
  0x18   :  { %p2930_p8 = por %p2929_p7, %p2928_p6 }
  0x1a   :  { %p2931_p9 = pnand %p2930_p8, %p2924_p5 }
  0x1c   :  { %2934 = shalt.err (!%p2931_p9)
}
  0x1d   :  { %s3049_s1 = smov 64   ;;  %s3050_s20 = smov 4  }
  0x1e   :  { %90 = dma.hbm_to_vmem [thread:$0]  %s4041_s13, 1024, %s85_s18, [#allocation9], %s3049_s1, %s3049_s1, %s3050_s20  }
  0x1f   :  { %s3051_s7 = smov [#allocation2]   ;;  %s3052_s24 = smov [#allocation7]  }
  0x20   :  { %s41_s23 = sshll.u32 %s3051_s7, 4  ;;  %s67_s25 = sshll.u32 %s3052_s24, 4  ;;  %s42_s23 = int_to_ptr.vmem [resolvable:$true] %s41_s23  ;;  %s68_s25 = int_to_ptr.vmem [resolvable:$true] %s67_s25 }
  0x21   :  { %s2943_s26 = scalar_lea.vmem %s42_s23, 32  ;;  %p2948_p11 = scmp.lt.s32.totalorder %s42_s23, %s42_s23 }
  0x22   :  { %p2944_p10 = scmp.ne.s32.totalorder %s42_s23, %s2943_s26  ;;  %p2949_p12 = scmp.lt.s32.totalorder %s2943_s26, %s2943_s26 }
  0x24   :  { %p2950_p13 = por %p2949_p12, %p2948_p11 }
  0x26   :  { %p2951_p0 = pnand %p2950_p13, %p2944_p10 }
  0x28   :  { %2954 = shalt.err (!%p2951_p0)
}
  0x29   :  { %44 = dma.hbm_to_vmem [thread:$0]  %s4032_s4, 32, %s42_s23, [#allocation3]  }
  0x2a   :  { %s2963_s29 = scalar_lea.vmem %s68_s25, 32  ;;  %p2968_p2 = scmp.lt.s32.totalorder %s68_s25, %s68_s25 }
  0x2b   :  { %p2964_p1 = scmp.ne.s32.totalorder %s68_s25, %s2963_s29  ;;  %p2969_p3 = scmp.lt.s32.totalorder %s2963_s29, %s2963_s29 }
  0x2d   :  { %p2970_p4 = por %p2969_p3, %p2968_p2 }
  0x2f   :  { %p2971_p5 = pnand %p2970_p4, %p2964_p1 }
  0x31   :  { %2974 = shalt.err (!%p2971_p5)
}
  0x32   :  { %70 = dma.hbm_to_vmem [thread:$0]  %s4036_s8, 32, %s68_s25, [#allocation6]  }
  0x33   :  { %s3053_s30 = smov [#allocation10]   ;;  %s3054_s19 = smov [#allocation11]  }
  0x34   :  { %s98_s18 = sshll.u32 %s3053_s30, 4  ;;  %s111_s21 = sshll.u32 %s3054_s19, 4  ;;  %s99_s18 = int_to_ptr.vmem [resolvable:$true] %s98_s18  ;;  %s112_s21 = int_to_ptr.vmem [resolvable:$true] %s111_s21 }
  0x35   :  { %s2983_s22 = scalar_lea.vmem %s99_s18, 1024  ;;  %p2988_p7 = scmp.lt.s32.totalorder %s99_s18, %s99_s18 }
  0x36   :  { %p2984_p6 = scmp.ne.s32.totalorder %s99_s18, %s2983_s22  ;;  %p2989_p8 = scmp.lt.s32.totalorder %s2983_s22, %s2983_s22 }
  0x38   :  { %p2990_p9 = por %p2989_p8, %p2988_p7 }
  0x3a   :  { %p2991_p10 = pnand %p2990_p9, %p2984_p6 }
  0x3c   :  { %2994 = shalt.err (!%p2991_p10)
}
  0x3d   :  { %104 = dma.hbm_to_vmem [thread:$0]  %s4043_s15, 1024, %s99_s18, [#allocation9], %s3049_s1, %s3049_s1, %s3050_s20  }
  0x3e   :  { %s3003_s8 = scalar_lea.vmem %s112_s21, 32  ;;  %p3008_p12 = scmp.lt.s32.totalorder %s112_s21, %s112_s21 }
  0x3f   :  { %p3004_p11 = scmp.ne.s32.totalorder %s112_s21, %s3003_s8  ;;  %p3009_p13 = scmp.lt.s32.totalorder %s3003_s8, %s3003_s8 }
  0x41   :  { %p3010_p0 = por %p3009_p13, %p3008_p12 }
  0x43   :  { %p3011_p1 = pnand %p3010_p0, %p3004_p11 }
  0x45   :  { %3014 = shalt.err (!%p3011_p1)
}
  0x46   :  { %114 = dma.hbm_to_vmem [thread:$0]  %s4044_s16, 32, %s112_s21, [#allocation12]  }
  0x47   :  { %3035 = dma.done.wait [#allocation3], 32  }
  0x48   :  { %3036 = vsyncadd [#allocation3], 4294967264 }
  0x49   :  { %3037 = dma.done.wait [#allocation6], 544  }
  0x4a   :  { %3038 = vsyncadd [#allocation6], 4294966752 }
  0x4b   :  { %3039 = dma.done.wait [#allocation9], 2048  }
  0x4c   :  { %3040 = vsyncadd [#allocation9], 4294965248 }
  0x4d   :  { %3041 = dma.done.wait [#allocation12], 32  }
  0x4e   :  { %3042 = vsyncadd [#allocation12], 4294967264  ;;  %v3055_v0 = vmov 0   ;;  %s4049_s20 = sld [smem:[#allocation20_spill]]  ;;  %v503_v34 = vld [vmem:[%s4030_s2 + $0xf8] sm:$0xff]  ;;  %v502_v39 = vld [vmem:[%s4030_s2 + $0xf0] sm:$0xff] }
  0x4f   :  { %365 = vmatprep.mubr.bf16.mxu0 %v3055_v0  ;;  %406 = vmatprep.mubr.bf16.mxu1 %v3055_v0  ;;  %s4050_s28 = sld [smem:[#allocation19_spill]]  ;;  %v535_v35 = vld [vmem:[%s4030_s2 + $0x1f8] sm:$0xff]  ;;  %v534_v40 = vld [vmem:[%s4030_s2 + $0x1f0] sm:$0xff]  ;;  %v501_v43 = vld [vmem:[%s4030_s2 + $0xe8] sm:$0xff]  ;;  %vm467_vm0 = vcmask 1040384   ;;  %vm704_vm1 = vcmask 130048  }
  0x50   :  { %v487_v37 = vld [vmem:[%s4030_s2 + $0x78] sm:$0xff]  ;;  %v486_v41 = vld [vmem:[%s4030_s2 + $0x70] sm:$0xff]  ;;  %v533_v44 = vld [vmem:[%s4030_s2 + $0x1e8] sm:$0xff]  ;;  %vm3057_vm3 = vmmov 0   ;;  %vm1911_vm4 = vcmask 64512  }
  0x51   :  { %v519_v38 = vld [vmem:[%s4030_s2 + $0x178] sm:$0xff]  ;;  %v518_v42 = vld [vmem:[%s4030_s2 + $0x170] sm:$0xff]  ;;  %v485_v45 = vld [vmem:[%s4030_s2 + $0x68] sm:$0xff] }
  0x52   :  { %v517_v46 = vld [vmem:[%s4030_s2 + $0x168] sm:$0xff]  ;;  %v500_v47 = vld [vmem:[%s4030_s2 + $0xe0] sm:$0xff]  ;;  %v499_v51 = vld [vmem:[%s4030_s2 + $0xd8] sm:$0xff] }
  0x53   :  { %v532_v48 = vld [vmem:[%s4030_s2 + $0x1e0] sm:$0xff]  ;;  %v531_v52 = vld [vmem:[%s4030_s2 + $0x1d8] sm:$0xff]  ;;  %v498_v55 = vld [vmem:[%s4030_s2 + $0xd0] sm:$0xff] }
  0x54   :  { %v2709_v1 = vld [vmem:[%s4049_s20 + $0xe4] ss:$16 sps:$4 sm:$0xff]   ;;  %v2711_v2 = vld [vmem:[%s4049_s20 + $0xec] ss:$16 sps:$4 sm:$0xff]   ;;  %v2713_v3 = vld [vmem:[%s4049_s20 + $0xe0] ss:$16 sps:$4 sm:$0xff]  }
  0x55   :  { %333 = vmatprep.subr.bf16.mxu0 %v2709_v1  ;;  %v2714_v4 = vld [vmem:[%s4049_s20 + $0xe8] ss:$16 sps:$4 sm:$0xff]   ;;  %374 = vmatprep.subr.bf16.mxu1 %v2711_v2  ;;  %v2715_v5 = vld [vmem:[%s4049_s20 + $0xc4] ss:$16 sps:$4 sm:$0xff]   ;;  %v2717_v6 = vld [vmem:[%s4049_s20 + $0xcc] ss:$16 sps:$4 sm:$0xff]  }
  0x56   :  { %334 = vmatpush1.bf16.msra.mxu0 %v2713_v3  ;;  %375 = vmatpush1.bf16.msra.mxu1 %v2714_v4  ;;  %v2719_v7 = vld [vmem:[%s4049_s20 + $0xc0] ss:$16 sps:$4 sm:$0xff]   ;;  %v2720_v8 = vld [vmem:[%s4049_s20 + $0xc8] ss:$16 sps:$4 sm:$0xff]   ;;  %v2721_v9 = vld [vmem:[%s4049_s20 + $0xa4] ss:$16 sps:$4 sm:$0xff]  }
  0x57   :  { %335 = vmatprep.subr.bf16.mxu0 %v2715_v5  ;;  %376 = vmatprep.subr.bf16.mxu1 %v2717_v6  ;;  %v2723_v10 = vld [vmem:[%s4049_s20 + $0xac] ss:$16 sps:$4 sm:$0xff]   ;;  %v2725_v11 = vld [vmem:[%s4049_s20 + $0xa0] ss:$16 sps:$4 sm:$0xff]   ;;  %v2726_v12 = vld [vmem:[%s4049_s20 + $0xa8] ss:$16 sps:$4 sm:$0xff]  }
  0x58   :  { %v2727_v13 = vld [vmem:[%s4049_s20 + $0x84] ss:$16 sps:$4 sm:$0xff]   ;;  %v2729_v14 = vld [vmem:[%s4049_s20 + $0x8c] ss:$16 sps:$4 sm:$0xff]   ;;  %v2731_v15 = vld [vmem:[%s4049_s20 + $0x80] ss:$16 sps:$4 sm:$0xff]  }
  0x59   :  { %v2732_v16 = vld [vmem:[%s4049_s20 + $0x88] ss:$16 sps:$4 sm:$0xff]   ;;  %v2733_v17 = vld [vmem:[%s4049_s20 + $0x64] ss:$16 sps:$4 sm:$0xff]   ;;  %v2735_v18 = vld [vmem:[%s4049_s20 + $0x6c] ss:$16 sps:$4 sm:$0xff]  }
  0x5a   :  { %336 = vmatpush1.bf16.msra.mxu0 %v2719_v7  ;;  %377 = vmatpush1.bf16.msra.mxu1 %v2720_v8  ;;  %v2737_v19 = vld [vmem:[%s4049_s20 + $0x60] ss:$16 sps:$4 sm:$0xff]   ;;  %v2738_v20 = vld [vmem:[%s4049_s20 + $0x68] ss:$16 sps:$4 sm:$0xff]   ;;  %v2739_v21 = vld [vmem:[%s4049_s20 + $0x44] ss:$16 sps:$4 sm:$0xff]  }
  0x5b   :  { %337 = vmatprep.subr.bf16.mxu0 %v2721_v9  ;;  %378 = vmatprep.subr.bf16.mxu1 %v2723_v10  ;;  %v2741_v22 = vld [vmem:[%s4049_s20 + $0x4c] ss:$16 sps:$4 sm:$0xff]   ;;  %v2743_v23 = vld [vmem:[%s4049_s20 + $0x40] ss:$16 sps:$4 sm:$0xff]   ;;  %v2744_v24 = vld [vmem:[%s4049_s20 + $0x48] ss:$16 sps:$4 sm:$0xff]  }
  0x5c   :  { %v2745_v25 = vld [vmem:[%s4049_s20 + $0x24] ss:$16 sps:$4 sm:$0xff]   ;;  %v2747_v26 = vld [vmem:[%s4049_s20 + $0x2c] ss:$16 sps:$4 sm:$0xff]   ;;  %v2749_v27 = vld [vmem:[%s4049_s20 + $0x20] ss:$16 sps:$4 sm:$0xff]  }
  0x5d   :  { %v2750_v28 = vld [vmem:[%s4049_s20 + $0x28] ss:$16 sps:$4 sm:$0xff]   ;;  %v2751_v29 = vld [vmem:[%s4049_s20 + $0x4] ss:$16 sps:$4 sm:$0xff]   ;;  %v2753_v30 = vld [vmem:[%s4049_s20 + $0xc] ss:$16 sps:$4 sm:$0xff]  }
  0x5e   :  { %338 = vmatpush1.bf16.msra.mxu0 %v2725_v11  ;;  %379 = vmatpush1.bf16.msra.mxu1 %v2726_v12  ;;  %v2755_v31 = vld [vmem:[%s4049_s20] ss:$16 sps:$4 sm:$0xff]   ;;  %v2756_v32 = vld [vmem:[%s4049_s20 + $0x8] ss:$16 sps:$4 sm:$0xff]  }
  0x5f   :  { %339 = vmatprep.subr.bf16.mxu0 %v2727_v13  ;;  %380 = vmatprep.subr.bf16.mxu1 %v2729_v14  ;;  %v134_v33 = vld [vmem:[%s4050_s28] sm:$0xff]  ;;  %v483_v53 = vld [vmem:[%s4030_s2 + $0x58] sm:$0xff]  ;;  %v530_v56 = vld [vmem:[%s4030_s2 + $0x1d0] sm:$0xff] }
  0x60   :  { %v140_v36 = vpack.c.bf16 %v134_v33, %v134_v33  ;;  %v484_v49 = vld [vmem:[%s4030_s2 + $0x60] sm:$0xff]  ;;  %v515_v54 = vld [vmem:[%s4030_s2 + $0x158] sm:$0xff]  ;;  %v482_v57 = vld [vmem:[%s4030_s2 + $0x50] sm:$0xff] }
  0x61   :  { %v516_v50 = vld [vmem:[%s4030_s2 + $0x160] sm:$0xff]  ;;  %v514_v58 = vld [vmem:[%s4030_s2 + $0x150] sm:$0xff]  ;;  %v497_v59 = vld [vmem:[%s4030_s2 + $0xc8] sm:$0xff] }
  0x62   :  { %340 = vmatpush1.bf16.msra.mxu0 %v2731_v15  ;;  %381 = vmatpush1.bf16.msra.mxu1 %v2732_v16  ;;  %v529_v60 = vld [vmem:[%s4030_s2 + $0x1c8] sm:$0xff]  ;;  %v496_v63 = vld [vmem:[%s4030_s2 + $0xc0] sm:$0xff]  ;;  %v495_v3 = vld [vmem:[%s4030_s2 + $0xb8] sm:$0xff] }
  0x63   :  { %341 = vmatprep.subr.bf16.mxu0 %v2733_v17  ;;  %382 = vmatprep.subr.bf16.mxu1 %v2735_v18  ;;  %v481_v61 = vld [vmem:[%s4030_s2 + $0x48] sm:$0xff]  ;;  %v528_v0 = vld [vmem:[%s4030_s2 + $0x1c0] sm:$0xff]  ;;  %v527_v4 = vld [vmem:[%s4030_s2 + $0x1b8] sm:$0xff] }
  0x64   :  { %v513_v62 = vld [vmem:[%s4030_s2 + $0x148] sm:$0xff]  ;;  %v480_v1 = vld [vmem:[%s4030_s2 + $0x40] sm:$0xff]  ;;  %v479_v5 = vld [vmem:[%s4030_s2 + $0x38] sm:$0xff] }
  0x65   :  { %v512_v2 = vld [vmem:[%s4030_s2 + $0x140] sm:$0xff]  ;;  %v511_v6 = vld [vmem:[%s4030_s2 + $0x138] sm:$0xff]  ;;  %v494_v7 = vld [vmem:[%s4030_s2 + $0xb0] sm:$0xff] }
  0x66   :  { %342 = vmatpush1.bf16.msra.mxu0 %v2737_v19  ;;  %383 = vmatpush1.bf16.msra.mxu1 %v2738_v20  ;;  %v526_v8 = vld [vmem:[%s4030_s2 + $0x1b0] sm:$0xff]  ;;  %v493_v11 = vld [vmem:[%s4030_s2 + $0xa8] sm:$0xff]  ;;  %v492_v15 = vld [vmem:[%s4030_s2 + $0xa0] sm:$0xff] }
  0x67   :  { %343 = vmatprep.subr.bf16.mxu0 %v2739_v21  ;;  %384 = vmatprep.subr.bf16.mxu1 %v2741_v22  ;;  %v478_v9 = vld [vmem:[%s4030_s2 + $0x30] sm:$0xff]  ;;  %v525_v12 = vld [vmem:[%s4030_s2 + $0x1a8] sm:$0xff]  ;;  %v524_v16 = vld [vmem:[%s4030_s2 + $0x1a0] sm:$0xff] }
  0x68   :  { %v510_v10 = vld [vmem:[%s4030_s2 + $0x130] sm:$0xff]  ;;  %v477_v13 = vld [vmem:[%s4030_s2 + $0x28] sm:$0xff]  ;;  %v476_v17 = vld [vmem:[%s4030_s2 + $0x20] sm:$0xff] }
  0x69   :  { %v509_v14 = vld [vmem:[%s4030_s2 + $0x128] sm:$0xff]  ;;  %v508_v18 = vld [vmem:[%s4030_s2 + $0x120] sm:$0xff]  ;;  %v491_v19 = vld [vmem:[%s4030_s2 + $0x98] sm:$0xff] }
  0x6a   :  { %344 = vmatpush1.bf16.msra.mxu0 %v2743_v23  ;;  %385 = vmatpush1.bf16.msra.mxu1 %v2744_v24  ;;  %v523_v20 = vld [vmem:[%s4030_s2 + $0x198] sm:$0xff]  ;;  %v490_v23 = vld [vmem:[%s4030_s2 + $0x90] sm:$0xff]  ;;  %v472_v33 = vld [vmem:[%s4030_s2] sm:$0xff] }
  0x6b   :  { %345 = vmatprep.subr.bf16.mxu0 %v2745_v25  ;;  %386 = vmatprep.subr.bf16.mxu1 %v2747_v26  ;;  %v475_v21 = vld [vmem:[%s4030_s2 + $0x18] sm:$0xff]  ;;  %v522_v24 = vld [vmem:[%s4030_s2 + $0x190] sm:$0xff] }
  0x6c   :  { %v507_v22 = vld [vmem:[%s4030_s2 + $0x118] sm:$0xff]  ;;  %v474_v25 = vld [vmem:[%s4030_s2 + $0x10] sm:$0xff] }
  0x6d   :  { %v506_v26 = vld [vmem:[%s4030_s2 + $0x110] sm:$0xff] }
  0x6e   :  { %346 = vmatpush1.bf16.msra.mxu0 %v2749_v27  ;;  %387 = vmatpush1.bf16.msra.mxu1 %v2750_v28  ;;  %v489_v27 = vld [vmem:[%s4030_s2 + $0x88] sm:$0xff] }
  0x6f   :  { %347 = vmatprep.subr.bf16.mxu0 %v2751_v29  ;;  %388 = vmatprep.subr.bf16.mxu1 %v2753_v30  ;;  %v521_v28 = vld [vmem:[%s4030_s2 + $0x188] sm:$0xff] }
  0x70   :  { %v473_v29 = vld [vmem:[%s4030_s2 + $0x8] sm:$0xff] }
  0x71   :  { %v505_v30 = vld [vmem:[%s4030_s2 + $0x108] sm:$0xff] }
  0x72   :  { %348 = vmatpush1.bf16.msra.mxu0 %v2755_v31  ;;  %389 = vmatpush1.bf16.msra.mxu1 %v2756_v32  ;;  %v488_v31 = vld [vmem:[%s4030_s2 + $0x80] sm:$0xff] }
  0x73   :  { %2451 = vmatprep.subr.mxu0 %v503_v34  ;;  %2486 = vmatprep.subr.mxu1 %v535_v35  ;;  %v520_v32 = vld [vmem:[%s4030_s2 + $0x180] sm:$0xff] }
  0x74   :  { %v504_v34 = vld [vmem:[%s4030_s2 + $0x100] sm:$0xff] }
  0x75   :  { %366 = vmatmul.mubr.bf16.vlgmr.msra.gmra.mxu0 %v140_v36  ;;  %407 = vmatmul.mubr.bf16.vlgmr.msra.gmra.mxu1 %v140_v36 }
  0x76   :  { %2452 = vmatpush3.msra.mxu0 %v487_v37  ;;  %2487 = vmatpush3.msra.mxu1 %v519_v38 }
  0x77   :  { %2453 = vmatprep.subr.mxu0 %v502_v39  ;;  %2488 = vmatprep.subr.mxu1 %v534_v40 }
  0x78   :  { %2454 = vmatpush3.msra.mxu0 %v486_v41  ;;  %2489 = vmatpush3.msra.mxu1 %v518_v42 }
  0x79   :  { %2455 = vmatprep.subr.mxu0 %v501_v43  ;;  %2490 = vmatprep.subr.mxu1 %v533_v44 }
  0x7a   :  { %2456 = vmatpush3.msra.mxu0 %v485_v45  ;;  %2491 = vmatpush3.msra.mxu1 %v517_v46 }
  0x7b   :  { %2457 = vmatprep.subr.mxu0 %v500_v47  ;;  %2492 = vmatprep.subr.mxu1 %v532_v48 }
  0x7c   :  { %2458 = vmatpush3.msra.mxu0 %v484_v49  ;;  %2493 = vmatpush3.msra.mxu1 %v516_v50 }
  0x7d   :  { %2459 = vmatprep.subr.mxu0 %v499_v51  ;;  %2494 = vmatprep.subr.mxu1 %v531_v52 }
  0x7e   :  { %2460 = vmatpush3.msra.mxu0 %v483_v53  ;;  %2495 = vmatpush3.msra.mxu1 %v515_v54 }
  0x7f   :  { %2461 = vmatprep.subr.mxu0 %v498_v55  ;;  %2496 = vmatprep.subr.mxu1 %v530_v56 }
  0x80   :  { %2462 = vmatpush3.msra.mxu0 %v482_v57  ;;  %2497 = vmatpush3.msra.mxu1 %v514_v58 }
  0x81   :  { %2463 = vmatprep.subr.mxu0 %v497_v59  ;;  %2498 = vmatprep.subr.mxu1 %v529_v60 }
  0x82   :  { %2464 = vmatpush3.msra.mxu0 %v481_v61  ;;  %2499 = vmatpush3.msra.mxu1 %v513_v62 }
  0x83   :  { %2465 = vmatprep.subr.mxu0 %v496_v63  ;;  %2500 = vmatprep.subr.mxu1 %v528_v0 }
  0x84   :  { %2466 = vmatpush3.msra.mxu0 %v480_v1  ;;  %2501 = vmatpush3.msra.mxu1 %v512_v2 }
  0x85   :  { %2467 = vmatprep.subr.mxu0 %v495_v3  ;;  %2502 = vmatprep.subr.mxu1 %v527_v4 }
  0x86   :  { %2468 = vmatpush3.msra.mxu0 %v479_v5  ;;  %2503 = vmatpush3.msra.mxu1 %v511_v6 }
  0x87   :  { %2469 = vmatprep.subr.mxu0 %v494_v7  ;;  %2504 = vmatprep.subr.mxu1 %v526_v8 }
  0x88   :  { %2470 = vmatpush3.msra.mxu0 %v478_v9  ;;  %2505 = vmatpush3.msra.mxu1 %v510_v10 }
  0x89   :  { %2471 = vmatprep.subr.mxu0 %v493_v11  ;;  %2506 = vmatprep.subr.mxu1 %v525_v12 }
  0x8a   :  { %2472 = vmatpush3.msra.mxu0 %v477_v13  ;;  %2507 = vmatpush3.msra.mxu1 %v509_v14 }
  0x8b   :  { %2473 = vmatprep.subr.mxu0 %v492_v15  ;;  %2508 = vmatprep.subr.mxu1 %v524_v16 }
  0x8c   :  { %2474 = vmatpush3.msra.mxu0 %v476_v17  ;;  %2509 = vmatpush3.msra.mxu1 %v508_v18 }
  0x8d   :  { %2475 = vmatprep.subr.mxu0 %v491_v19  ;;  %2510 = vmatprep.subr.mxu1 %v523_v20 }
  0x8e   :  { %2476 = vmatpush3.msra.mxu0 %v475_v21  ;;  %2511 = vmatpush3.msra.mxu1 %v507_v22 }
  0x8f   :  { %2477 = vmatprep.subr.mxu0 %v490_v23  ;;  %2512 = vmatprep.subr.mxu1 %v522_v24 }
  0x90   :  { %2478 = vmatpush3.msra.mxu0 %v474_v25  ;;  %2513 = vmatpush3.msra.mxu1 %v506_v26 }
  0x91   :  { %2479 = vmatprep.subr.mxu0 %v489_v27  ;;  %2514 = vmatprep.subr.mxu1 %v521_v28 }
  0x92   :  { %2480 = vmatpush3.msra.mxu0 %v473_v29  ;;  %2515 = vmatpush3.msra.mxu1 %v505_v30 }
  0x93   :  { %2481 = vmatprep.subr.mxu0 %v488_v31  ;;  %2516 = vmatprep.subr.mxu1 %v520_v32 }
  0x94   :  { %2482 = vmatpush3.msra.mxu0 %v472_v33  ;;  %2517 = vmatpush3.msra.mxu1 %v504_v34 }
 0x135   :  { %v3464_v35 = vpop.f32.mrf.mxu0  ;;  %v3466_v36 = vpop.f32.mrf.mxu1 }
 0x136   :  { %v415_v37 = vrot.slane %v3464_v35, 4  ;;  %v439_v38 = vmul.f32 %v3464_v35, %v3464_v35  ;;  %v427_v39 = vrot.slane %v3466_v36, 4  ;;  %v441_v40 = vmul.f32 %v3466_v36, %v3466_v36 }
 0x137   :  { %v3474_v41 = vpop.f32.mrf.mxu0  ;;  %v3476_v42 = vpop.f32.mrf.mxu1 }
 0x138   :  { %v416_v43 = vadd.f32 %v415_v37, %v3464_v35  ;;  %v443_v44 = vrot.slane %v439_v38, 4  ;;  %v428_v45 = vadd.f32 %v427_v39, %v3466_v36  ;;  %v455_v46 = vrot.slane %v441_v40, 4  ;;  %v701_v37 = vld [vmem:[%s4031_s3 + $0x28] sm:$0xff] }
 0x139   :  { %v421_v47 = vrot.slane %v3474_v41, 4  ;;  %v440_v48 = vmul.f32 %v3474_v41, %v3474_v41  ;;  %v433_v49 = vrot.slane %v3476_v42, 4  ;;  %v442_v50 = vmul.f32 %v3476_v42, %v3476_v42  ;;  %v371_v51 = vpop.f32.mrf.mxu0  ;;  %v412_v52 = vpop.f32.mrf.mxu1  ;;  %736 = vmatprep.subr.mxu1 %v701_v37  ;;  %v697_v39 = vld [vmem:[%s4031_s3 + $0x8] sm:$0xff] }
 0x13a   :  { %v417_v53 = vrot.slane %v416_v43, 2  ;;  %v444_v54 = vadd.f32 %v443_v44, %v439_v38  ;;  %v429_v55 = vrot.slane %v428_v45, 2  ;;  %v456_v56 = vadd.f32 %v455_v46, %v441_v40  ;;  %v700_v38 = vld [vmem:[%s4031_s3 + $0x20] sm:$0xff]  ;;  %v2759_v46 = vld [vmem:[%s4033_s5 + $0x74] ss:$8 sps:$4 sm:$0xff]  }
 0x13b   :  { %v422_v57 = vadd.f32 %v421_v47, %v3474_v41  ;;  %v449_v58 = vrot.slane %v440_v48, 4  ;;  %v434_v59 = vadd.f32 %v433_v49, %v3476_v42  ;;  %v461_v60 = vrot.slane %v442_v50, 4  ;;  %v372_v61 = vpop.f32.mrf.mxu0  ;;  %v413_v62 = vpop.f32.mrf.mxu1  ;;  %v696_v40 = vld [vmem:[%s4031_s3] sm:$0xff]  ;;  %1286 = vmatprep.subr.bf16.mxu0 %v2759_v46  ;;  %v2768_v49 = vld [vmem:[%s4033_s5 + $0x54] ss:$8 sps:$4 sm:$0xff]  }
 0x13c   :  { %v445_v63 = vrot.slane %v444_v54, 2  ;;  %v457_v0 = vrot.slane %v456_v56, 2  ;;  %v418_v5 = vadd.f32 %v417_v53, %v416_v43  ;;  %v430_v7 = vadd.f32 %v429_v55, %v428_v45  ;;  %v703_v43 = vld [vmem:[%s4031_s3 + $0x38] sm:$0xff]  ;;  %v2762_v47 = vld [vmem:[%s4033_s5 + $0x64] ss:$8 sps:$4 sm:$0xff]  }
 0x13d   :  { %v423_v1 = vrot.slane %v422_v57, 2  ;;  %v450_v2 = vadd.f32 %v449_v58, %v440_v48  ;;  %v435_v3 = vrot.slane %v434_v59, 2  ;;  %v462_v4 = vadd.f32 %v461_v60, %v442_v50  ;;  %v2757_v45 = vld [vmem:[%s4033_s5 + $0x70] ss:$8 sps:$4 sm:$0xff]   ;;  %v2760_v48 = vld [vmem:[%s4033_s5 + $0x60] ss:$8 sps:$4 sm:$0xff]  }
 0x13e   :  { %v446_v6 = vadd.f32 %v445_v63, %v444_v54  ;;  %v458_v8 = vadd.f32 %v457_v0, %v456_v56  ;;  %v419_v19 = vrot.slane %v418_v5, 1  ;;  %v431_v20 = vrot.slane %v430_v7, 1  ;;  %v2766_v50 = vld [vmem:[%s4033_s5 + $0x50] ss:$8 sps:$4 sm:$0xff]   ;;  %v2774_v51 = vld [vmem:[%s4033_s5 + $0x44] ss:$8 sps:$4 sm:$0xff]  }
 0x13f   :  { %v424_v9 = vadd.f32 %v423_v1, %v422_v57  ;;  %v451_v10 = vrot.slane %v450_v2, 2  ;;  %v436_v11 = vadd.f32 %v435_v3, %v434_v59  ;;  %v463_v12 = vrot.slane %v462_v4, 2  ;;  %v2772_v52 = vld [vmem:[%s4033_s5 + $0x40] ss:$8 sps:$4 sm:$0xff]   ;;  %v2780_v53 = vld [vmem:[%s4033_s5 + $0x34] ss:$8 sps:$4 sm:$0xff]  }
 0x140   :  { %v447_v13 = vrot.slane %v446_v6, 1  ;;  %v459_v14 = vrot.slane %v458_v8, 1  ;;  %v420_v29 = vadd.f32 %v419_v19, %v418_v5  ;;  %v432_v30 = vadd.f32 %v431_v20, %v430_v7  ;;  %v2778_v54 = vld [vmem:[%s4033_s5 + $0x30] ss:$8 sps:$4 sm:$0xff]   ;;  %v2786_v55 = vld [vmem:[%s4033_s5 + $0x24] ss:$8 sps:$4 sm:$0xff]  }
 0x141   :  { %v425_v15 = vrot.slane %v424_v9, 1  ;;  %v452_v16 = vadd.f32 %v451_v10, %v450_v2  ;;  %v437_v17 = vrot.slane %v436_v11, 1  ;;  %v464_v18 = vadd.f32 %v463_v12, %v462_v4  ;;  %v2784_v56 = vld [vmem:[%s4033_s5 + $0x20] ss:$8 sps:$4 sm:$0xff]   ;;  %v2792_v57 = vld [vmem:[%s4033_s5 + $0x14] ss:$8 sps:$4 sm:$0xff]  }
 0x142   :  { %v448_v23 = vadd.f32 %v447_v13, %v446_v6  ;;  %v460_v24 = vadd.f32 %v459_v14, %v458_v8  ;;  %v3056_v44 = vmov 0.0   ;;  %v2790_v58 = vld [vmem:[%s4033_s5 + $0x10] ss:$8 sps:$4 sm:$0xff]   ;;  %v2798_v59 = vld [vmem:[%s4033_s5 + $0x4] ss:$8 sps:$4 sm:$0xff]  }
 0x143   :  { %v453_v21 = vrot.slane %v452_v16, 1  ;;  %v465_v22 = vrot.slane %v464_v18, 1  ;;  %v426_v25 = vadd.f32 %v425_v15, %v424_v9  ;;  %v438_v27 = vadd.f32 %v437_v17, %v436_v11  ;;  %v2796_v60 = vld [vmem:[%s4033_s5] ss:$8 sps:$4 sm:$0xff]   ;;  %v2804_v61 = vld [vmem:[%s4033_s5 + $0xf4] ss:$8 sps:$4 sm:$0xff]  }
 0x144   :  { %v468_v33 = vsel %vm467_vm0, %v420_v29, %v448_v23  ;;  %v470_v34 = vsel %vm467_vm0, %v432_v30, %v460_v24  ;;  %v2802_v62 = vld [vmem:[%s4033_s5 + $0xf0] ss:$8 sps:$4 sm:$0xff]   ;;  %v2810_v63 = vld [vmem:[%s4033_s5 + $0xe4] ss:$8 sps:$4 sm:$0xff]   ;;  %v2808_v0 = vld [vmem:[%s4033_s5 + $0xe0] ss:$8 sps:$4 sm:$0xff]  }
 0x145   :  { %v454_v26 = vadd.f32 %v453_v21, %v452_v16  ;;  %v466_v28 = vadd.f32 %v465_v22, %v464_v18  ;;  %v2816_v1 = vld [vmem:[%s4033_s5 + $0xd4] ss:$8 sps:$4 sm:$0xff]   ;;  %v2814_v2 = vld [vmem:[%s4033_s5 + $0xd0] ss:$8 sps:$4 sm:$0xff]   ;;  %v2822_v3 = vld [vmem:[%s4033_s5 + $0xc4] ss:$8 sps:$4 sm:$0xff]  }
 0x146   :  { %v2820_v4 = vld [vmem:[%s4033_s5 + $0xc0] ss:$8 sps:$4 sm:$0xff]   ;;  %v2765_v29 = vld [vmem:[%s4033_s5 + $0x174] ss:$8 sps:$4 sm:$0xff]   ;;  %v2763_v30 = vld [vmem:[%s4033_s5 + $0x170] ss:$8 sps:$4 sm:$0xff]  }
 0x147   :  { %v469_v31 = vsel %vm467_vm0, %v426_v25, %v454_v26  ;;  %v471_v32 = vsel %vm467_vm0, %v438_v27, %v466_v28  ;;  %v685_v19 = vld [vmem:[#allocation2] sm:$0x3]  ;;  %v702_v25 = vld [vmem:[%s4031_s3 + $0x30] sm:$0xff]  ;;  %v699_v27 = vld [vmem:[%s4031_s3 + $0x18] sm:$0xff] }
 0x148   :  { %600 = vmatprep.mubr.f32.mxu0 %v469_v31  ;;  %670 = vmatprep.mubr.f32.mxu1 %v471_v32  ;;  %v698_v28 = vld [vmem:[%s4031_s3 + $0x10] sm:$0xff]  ;;  %v2771_v31 = vld [vmem:[%s4033_s5 + $0x164] ss:$8 sps:$4 sm:$0xff]   ;;  %v2769_v32 = vld [vmem:[%s4033_s5 + $0x160] ss:$8 sps:$4 sm:$0xff]  }
 0x149   :  { %601 = vmatmul.mubr.f32.vlgmr.msra.gmra.mxu0 %v468_v33  ;;  %671 = vmatmul.mubr.f32.vlgmr.msra.gmra.mxu1 %v470_v34  ;;  %v2777_v33 = vld [vmem:[%s4033_s5 + $0x154] ss:$8 sps:$4 sm:$0xff]   ;;  %v2775_v34 = vld [vmem:[%s4033_s5 + $0x150] ss:$8 sps:$4 sm:$0xff]   ;;  %v2783_v37 = vld [vmem:[%s4033_s5 + $0x144] ss:$8 sps:$4 sm:$0xff]  }
 0x14a   :  { %737 = vmatpush1.msra.mxu1 %v700_v38  ;;  %772 = vmatprep.mubr.f32.mxu1 %v3056_v44  ;;  %v2781_v38 = vld [vmem:[%s4033_s5 + $0x140] ss:$8 sps:$4 sm:$0xff]   ;;  %v2801_v46 = vld [vmem:[%s4033_s5 + $0x114] ss:$8 sps:$4 sm:$0xff]  }
 0x14b   :  { %738 = vmatprep.subr.mxu1 %v697_v39  ;;  %1287 = vmatpush1.bf16.msra.mxu0 %v2757_v45  ;;  %v2789_v39 = vld [vmem:[%s4033_s5 + $0x134] ss:$8 sps:$4 sm:$0xff]   ;;  %v2793_v45 = vld [vmem:[%s4033_s5 + $0x120] ss:$8 sps:$4 sm:$0xff]  }
 0x14c   :  { %739 = vmatpush1.msra.mxu1 %v696_v40  ;;  %1288 = vmatprep.subr.bf16.mxu0 %v2762_v47  ;;  %v2787_v40 = vld [vmem:[%s4033_s5 + $0x130] ss:$8 sps:$4 sm:$0xff]  }
 0x14d   :  { %807 = vmatprep.subr.mxu1 %v703_v43  ;;  %v2795_v43 = vld [vmem:[%s4033_s5 + $0x124] ss:$8 sps:$4 sm:$0xff]   ;;  %v2799_v47 = vld [vmem:[%s4033_s5 + $0x110] ss:$8 sps:$4 sm:$0xff]  }
 0x14f   :  { %1289 = vmatpush1.bf16.msra.mxu0 %v2760_v48  ;;  %v2807_v48 = vld [vmem:[%s4033_s5 + $0x104] ss:$8 sps:$4 sm:$0xff]  }
 0x150   :  { %1290 = vmatprep.subr.bf16.mxu0 %v2768_v49  ;;  %v2805_v49 = vld [vmem:[%s4033_s5 + $0x100] ss:$8 sps:$4 sm:$0xff]  }
 0x153   :  { %1291 = vmatpush1.bf16.msra.mxu0 %v2766_v50  ;;  %v2813_v50 = vld [vmem:[%s4033_s5 + $0x1f4] ss:$8 sps:$4 sm:$0xff]  }
 0x154   :  { %1292 = vmatprep.subr.bf16.mxu0 %v2774_v51  ;;  %v2811_v51 = vld [vmem:[%s4033_s5 + $0x1f0] ss:$8 sps:$4 sm:$0xff]  }
 0x157   :  { %1293 = vmatpush1.bf16.msra.mxu0 %v2772_v52  ;;  %v2819_v52 = vld [vmem:[%s4033_s5 + $0x1e4] ss:$8 sps:$4 sm:$0xff]  }
 0x158   :  { %1294 = vmatprep.subr.bf16.mxu0 %v2780_v53  ;;  %v2817_v53 = vld [vmem:[%s4033_s5 + $0x1e0] ss:$8 sps:$4 sm:$0xff]  }
 0x15b   :  { %1295 = vmatpush1.bf16.msra.mxu0 %v2778_v54  ;;  %v2825_v54 = vld [vmem:[%s4033_s5 + $0x1d4] ss:$8 sps:$4 sm:$0xff]  }
 0x15c   :  { %1296 = vmatprep.subr.bf16.mxu0 %v2786_v55  ;;  %v2823_v55 = vld [vmem:[%s4033_s5 + $0x1d0] ss:$8 sps:$4 sm:$0xff]  }
 0x15f   :  { %1297 = vmatpush1.bf16.msra.mxu0 %v2784_v56  ;;  %v2828_v56 = vld [vmem:[%s4033_s5 + $0xb4] ss:$8 sps:$4 sm:$0xff]  }
 0x160   :  { %1298 = vmatprep.subr.bf16.mxu0 %v2792_v57  ;;  %v2831_v57 = vld [vmem:[%s4033_s5 + $0x1c4] ss:$8 sps:$4 sm:$0xff]  }
 0x163   :  { %1299 = vmatpush1.bf16.msra.mxu0 %v2790_v58  ;;  %v2826_v58 = vld [vmem:[%s4033_s5 + $0xb0] ss:$8 sps:$4 sm:$0xff]  }
 0x164   :  { %1300 = vmatprep.subr.bf16.mxu0 %v2798_v59  ;;  %v2829_v59 = vld [vmem:[%s4033_s5 + $0x1c0] ss:$8 sps:$4 sm:$0xff]  }
 0x167   :  { %1301 = vmatpush1.bf16.msra.mxu0 %v2796_v60  ;;  %v2834_v60 = vld [vmem:[%s4033_s5 + $0xa4] ss:$8 sps:$4 sm:$0xff]  }
 0x168   :  { %1302 = vmatprep.subr.bf16.mxu0 %v2804_v61  ;;  %v2837_v61 = vld [vmem:[%s4033_s5 + $0x1b4] ss:$8 sps:$4 sm:$0xff]  }
 0x16b   :  { %1303 = vmatpush2.bf16.msra.mxu0 %v2802_v62  ;;  %v2832_v62 = vld [vmem:[%s4033_s5 + $0xa0] ss:$8 sps:$4 sm:$0xff]  }
 0x16c   :  { %1304 = vmatprep.subr.bf16.mxu0 %v2810_v63  ;;  %v2835_v63 = vld [vmem:[%s4033_s5 + $0x1b0] ss:$8 sps:$4 sm:$0xff]  }
 0x16f   :  { %1305 = vmatpush2.bf16.msra.mxu0 %v2808_v0  ;;  %v2840_v0 = vld [vmem:[%s4033_s5 + $0x94] ss:$8 sps:$4 sm:$0xff]  }
 0x170   :  { %1306 = vmatprep.subr.bf16.mxu0 %v2816_v1  ;;  %v2843_v1 = vld [vmem:[%s4033_s5 + $0x1a4] ss:$8 sps:$4 sm:$0xff]  }
 0x173   :  { %1307 = vmatpush2.bf16.msra.mxu0 %v2814_v2  ;;  %v2838_v2 = vld [vmem:[%s4033_s5 + $0x90] ss:$8 sps:$4 sm:$0xff]  }
 0x174   :  { %1308 = vmatprep.subr.bf16.mxu0 %v2822_v3  ;;  %v2841_v3 = vld [vmem:[%s4033_s5 + $0x1a0] ss:$8 sps:$4 sm:$0xff]  }
 0x177   :  { %1309 = vmatpush2.bf16.msra.mxu0 %v2820_v4  ;;  %v2846_v4 = vld [vmem:[%s4033_s5 + $0x84] ss:$8 sps:$4 sm:$0xff]  }
 0x178   :  { %1310 = vmatprep.subr.bf16.mxu0 %v2828_v56  ;;  %v1423_v56 = vld [vmem:[%s4034_s6 + $0xd8] sm:$0xff] }
 0x17b   :  { %1311 = vmatpush2.bf16.msra.mxu0 %v2826_v58  ;;  %v1422_v58 = vld [vmem:[%s4034_s6 + $0xd0] sm:$0xff] }
 0x17c   :  { %1312 = vmatprep.subr.bf16.mxu0 %v2834_v60  ;;  %v1421_v60 = vld [vmem:[%s4034_s6 + $0xc8] sm:$0xff] }
 0x17f   :  { %1313 = vmatpush2.bf16.msra.mxu0 %v2832_v62  ;;  %v1420_v62 = vld [vmem:[%s4034_s6 + $0xc0] sm:$0xff] }
 0x180   :  { %1314 = vmatprep.subr.bf16.mxu0 %v2840_v0  ;;  %v1419_v0 = vld [vmem:[%s4034_s6 + $0xb8] sm:$0xff] }
 0x183   :  { %1315 = vmatpush2.bf16.msra.mxu0 %v2838_v2  ;;  %v1418_v2 = vld [vmem:[%s4034_s6 + $0xb0] sm:$0xff] }
 0x184   :  { %1316 = vmatprep.subr.bf16.mxu0 %v2846_v4  ;;  %v1417_v4 = vld [vmem:[%s4034_s6 + $0xa8] sm:$0xff] }
 0x209   :  { %v2483_v5 = vpop.f32.mrf.mxu0  ;;  %v2518_v6 = vpop.f32.mrf.mxu1 }
 0x20b   :  { %v2484_v7 = vpop.f32.mrf.mxu0  ;;  %v2519_v8 = vpop.f32.mrf.mxu1 }
 0x20c   :  { %v2485_v9 = vadd.f32 %v2484_v7, %v2483_v5  ;;  %v2520_v10 = vadd.f32 %v2519_v8, %v2518_v6  ;;  %v2849_v5 = vld [vmem:[%s4033_s5 + $0x194] ss:$8 sps:$4 sm:$0xff]   ;;  %v2844_v6 = vld [vmem:[%s4033_s5 + $0x80] ss:$8 sps:$4 sm:$0xff]   ;;  %v2847_v7 = vld [vmem:[%s4033_s5 + $0x190] ss:$8 sps:$4 sm:$0xff]  }
 0x20d   :  { %1317 = vmatpush2.bf16.msra.mxu0 %v2844_v6  ;;  %v2852_v8 = vld [vmem:[%s4033_s5 + $0x184] ss:$8 sps:$4 sm:$0xff]  }
 0x20e   :  { %v673_v11 = vadd.f32 %v2520_v10, %v2485_v9  ;;  %v2850_v9 = vld [vmem:[%s4033_s5 + $0x180] ss:$8 sps:$4 sm:$0xff]   ;;  %v1427_v10 = vld [vmem:[%s4034_s6 + $0xf8] sm:$0xff] }
 0x20f   :  { %2521 = vmatprep.subr.mxu0 %v1427_v10  ;;  %v1416_v6 = vld [vmem:[%s4034_s6 + $0xa0] sm:$0xff]  ;;  %v1414_v10 = vld [vmem:[%s4034_s6 + $0x90] sm:$0xff] }
 0x210   :  { %v676_v12 = vmul.f32 0.008064516, %v673_v11  ;;  %v135_v11 = vlaneseq }
 0x212   :  { %v677_v13 = vmul.f32 %v676_v12, %v676_v12 }
 0x214   :  { %v679_v14 = vrot.slane %v677_v13, 7 }
 0x216   :  { %v681_v15 = vsub.f32 %v676_v12, %v679_v14 }
 0x218   :  { %v682_v16 = vmax.f32 %v681_v15, 0.0 }
 0x21a   :  { %v683_v17 = vadd.f32 1e-05, %v682_v16 }
 0x21c   :  { %2885 = vrsqrt.f32 %v683_v17 }
 0x229   :  { %v2886_v18 = vpop.eup %2885 }
 0x22a   :  { %v687_v20 = vrot.slane %v2886_v18, 1 }
 0x22c   :  { %v689_v21 = vmul.f32 %v687_v20, %v685_v19 }
 0x22e   :  { %v690_v22 = vmul.f32 %v689_v21, %v676_v12  ;;  %v136_v12 = vshrl.u32 %v135_v11, 7  ;;  %v1398_v11 = vld [vmem:[%s4034_s6 + $0x10] sm:$0xff] }
 0x230   :  { %v692_v23 = vrot.slane %v690_v22, 7  ;;  %v3716_v13 = vsub.s32 0, %v136_v12  ;;  %v3718_v14 = vsub.s32 1, %v136_v12  ;;  %vm137_vm2 = vcmp.lt.s32.totalorder %v136_v12, 4  ;;  %v1413_v12 = vld [vmem:[%s4034_s6 + $0x88] sm:$0xff] }
 0x232   :  { %v694_v24 = vsub.f32 %v685_v19, %v692_v23 }
 0x234   :  { %v695_v26 = vsel %vm467_vm0, %v689_v21, %v694_v24 }
 0x235   :  { %2351 = vmatmul.mubr.msk.f32.vlgmr.msra.gmra.mxu1 %vm704_vm1, %v695_v26 }
 0x236   :  { %808 = vmatpush1.msra.mxu1 %v702_v25  ;;  %843 = vmatprep.mubr.f32.mxu1 %v3056_v44 }
 0x237   :  { %809 = vmatprep.subr.mxu1 %v699_v27 }
 0x238   :  { %810 = vmatpush1.msra.mxu1 %v698_v28 }
 0x239   :  { %2352 = vmatmul.mubr.msk.f32.vlgmr.msra.gmra.mxu1 %vm704_vm1, %v695_v26  ;;  %1327 = vmatprep.subr.bf16.mxu1 %v2765_v29  ;;  %v3728_v26 = vsel %vm137_vm2, 1.0, %v3056_v44 }
 0x23a   :  { %1328 = vmatpush1.bf16.msra.mxu1 %v2763_v30 }
 0x23b   :  { %1329 = vmatprep.subr.bf16.mxu1 %v2771_v31 }
 0x23e   :  { %1330 = vmatpush1.bf16.msra.mxu1 %v2769_v32 }
 0x23f   :  { %1331 = vmatprep.subr.bf16.mxu1 %v2777_v33 }
 0x242   :  { %1332 = vmatpush1.bf16.msra.mxu1 %v2775_v34 }
 0x243   :  { %1333 = vmatprep.subr.bf16.mxu1 %v2783_v37 }
 0x246   :  { %1334 = vmatpush1.bf16.msra.mxu1 %v2781_v38 }
 0x247   :  { %1335 = vmatprep.subr.bf16.mxu1 %v2789_v39 }
 0x24a   :  { %1336 = vmatpush1.bf16.msra.mxu1 %v2787_v40 }
 0x24b   :  { %1337 = vmatprep.subr.bf16.mxu1 %v2795_v43 }
 0x24e   :  { %1338 = vmatpush1.bf16.msra.mxu1 %v2793_v45 }
 0x24f   :  { %1339 = vmatprep.subr.bf16.mxu1 %v2801_v46 }
 0x252   :  { %1340 = vmatpush1.bf16.msra.mxu1 %v2799_v47 }
 0x253   :  { %1341 = vmatprep.subr.bf16.mxu1 %v2807_v48  ;;  %v1426_v48 = vld [vmem:[%s4034_s6 + $0xf0] sm:$0xff] }
 0x256   :  { %1342 = vmatpush1.bf16.msra.mxu1 %v2805_v49  ;;  %v1410_v49 = vld [vmem:[%s4034_s6 + $0x70] sm:$0xff] }
 0x257   :  { %1343 = vmatprep.subr.bf16.mxu1 %v2813_v50 }
 0x25a   :  { %1344 = vmatpush2.bf16.msra.mxu1 %v2811_v51  ;;  %v1425_v51 = vld [vmem:[%s4034_s6 + $0xe8] sm:$0xff] }
 0x25b   :  { %1345 = vmatprep.subr.bf16.mxu1 %v2819_v52 }
 0x25e   :  { %1346 = vmatpush2.bf16.msra.mxu1 %v2817_v53  ;;  %v1409_v53 = vld [vmem:[%s4034_s6 + $0x68] sm:$0xff] }
 0x25f   :  { %1347 = vmatprep.subr.bf16.mxu1 %v2825_v54  ;;  %v1424_v54 = vld [vmem:[%s4034_s6 + $0xe0] sm:$0xff] }
 0x262   :  { %1348 = vmatpush2.bf16.msra.mxu1 %v2823_v55  ;;  %v1408_v55 = vld [vmem:[%s4034_s6 + $0x60] sm:$0xff] }
 0x263   :  { %1349 = vmatprep.subr.bf16.mxu1 %v2831_v57  ;;  %v1407_v57 = vld [vmem:[%s4034_s6 + $0x58] sm:$0xff] }
 0x266   :  { %1350 = vmatpush2.bf16.msra.mxu1 %v2829_v59  ;;  %v1406_v59 = vld [vmem:[%s4034_s6 + $0x50] sm:$0xff] }
 0x267   :  { %1351 = vmatprep.subr.bf16.mxu1 %v2837_v61  ;;  %v1405_v61 = vld [vmem:[%s4034_s6 + $0x48] sm:$0xff] }
 0x26a   :  { %1352 = vmatpush2.bf16.msra.mxu1 %v2835_v63  ;;  %v1404_v63 = vld [vmem:[%s4034_s6 + $0x40] sm:$0xff] }
 0x26b   :  { %1353 = vmatprep.subr.bf16.mxu1 %v2843_v1  ;;  %v1403_v1 = vld [vmem:[%s4034_s6 + $0x38] sm:$0xff] }
 0x26e   :  { %1354 = vmatpush2.bf16.msra.mxu1 %v2841_v3  ;;  %v1402_v3 = vld [vmem:[%s4034_s6 + $0x30] sm:$0xff] }
 0x26f   :  { %1355 = vmatprep.subr.bf16.mxu1 %v2849_v5  ;;  %v1401_v5 = vld [vmem:[%s4034_s6 + $0x28] sm:$0xff] }
 0x272   :  { %1356 = vmatpush2.bf16.msra.mxu1 %v2847_v7  ;;  %v1400_v7 = vld [vmem:[%s4034_s6 + $0x20] sm:$0xff] }
 0x273   :  { %1357 = vmatprep.subr.bf16.mxu1 %v2852_v8  ;;  %v1415_v8 = vld [vmem:[%s4034_s6 + $0x98] sm:$0xff] }
 0x276   :  { %1358 = vmatpush2.bf16.msra.mxu1 %v2850_v9  ;;  %v1399_v9 = vld [vmem:[%s4034_s6 + $0x18] sm:$0xff] }
 0x2f5   :  { %v774_v15 = vpop.f32.mrf.mxu1 }
 0x2f6   :  { %v853_v16 = vrot.slane %v774_v15, %v3716_v13  ;;  %v873_v19 = vrot.slane %v774_v15, %v3718_v14  ;;  %v1397_v15 = vld [vmem:[%s4034_s6 + $0x8] sm:$0xff] }
 0x2f7   :  { %v776_v17 = vpop.f32.mrf.mxu1 }
 0x2f8   :  { %v866_v18 = vmul.f32 %v853_v16, %v3464_v35  ;;  %v857_v20 = vrot.slane %v776_v17, %v3716_v13  ;;  %v877_v24 = vrot.slane %v776_v17, %v3718_v14  ;;  %v1412_v16 = vld [vmem:[%s4034_s6 + $0x80] sm:$0xff] }
 0x2f9   :  { %v845_v21 = vpop.f32.mrf.mxu1  ;;  %v1396_v17 = vld [vmem:[%s4034_s6] sm:$0xff] }
 0x2fa   :  { %v886_v22 = vadd.f32 %v873_v19, %v866_v18  ;;  %v867_v23 = vmul.f32 %v857_v20, %v3474_v41  ;;  %v861_v25 = vrot.slane %v845_v21, %v3716_v13  ;;  %v881_v27 = vrot.slane %v845_v21, %v3718_v14 }
 0x2fb   :  { %v847_v28 = vpop.f32.mrf.mxu1 }
 0x2fc   :  { %v890_v29 = vmax.f32 %v886_v22, 0.0  ;;  %v887_v35 = vadd.f32 %v877_v24, %v867_v23  ;;  %v868_v30 = vmul.f32 %v861_v25, %v3466_v36  ;;  %v865_v31 = vrot.slane %v847_v28, %v3716_v13  ;;  %v1411_v36 = vld [vmem:[%s4034_s6 + $0x78] sm:$0xff] }
 0x2fd   :  { %v885_v34 = vrot.slane %v847_v28, %v3718_v14 }
 0x2fe   :  { %v891_v32 = vmax.f32 %v887_v35, 0.0  ;;  %v888_v33 = vadd.f32 %v881_v27, %v868_v30  ;;  %v869_v41 = vmul.f32 %v865_v31, %v3476_v42  ;;  %v894_v37 = vmul.f32 %v3728_v26, %v890_v29 }
 0x300   :  { %v892_v38 = vmax.f32 %v888_v33, 0.0  ;;  %v889_v39 = vadd.f32 %v885_v34, %v869_v41  ;;  %v895_v40 = vmul.f32 %v3728_v26, %v891_v32  ;;  %v898_v46 = vpack.c.bf16 %v894_v37, %v894_v37 }
 0x302   :  { %v893_v43 = vmax.f32 %v889_v39, 0.0  ;;  %v899_v45 = vpack.c.bf16 %v895_v40, %v895_v40  ;;  %v896_v47 = vmul.f32 %v3728_v26, %v892_v38 }
 0x304   :  { %1318 = vmatprep.mubr.bf16.mxu0 %v899_v45  ;;  %v897_v42 = vmul.f32 %v3728_v26, %v893_v43  ;;  %v900_v52 = vpack.c.bf16 %v896_v47, %v896_v47 }
 0x305   :  { %1319 = vmatmul.mubr.bf16.vlgmr.msra.gmra.mxu0 %v898_v46 }
 0x306   :  { %v901_v50 = vpack.c.bf16 %v897_v42, %v897_v42  ;;  %2522 = vmatpush3.msra.mxu0 %v1411_v36 }
 0x307   :  { %2523 = vmatprep.subr.mxu0 %v1426_v48 }
 0x308   :  { %1359 = vmatprep.mubr.bf16.mxu1 %v901_v50  ;;  %2524 = vmatpush3.msra.mxu0 %v1410_v49 }
 0x309   :  { %1360 = vmatmul.mubr.bf16.vlgmr.msra.gmra.mxu1 %v900_v52  ;;  %2525 = vmatprep.subr.mxu0 %v1425_v51 }
 0x30a   :  { %2526 = vmatpush3.msra.mxu0 %v1409_v53  ;;  %1589 = vmatprep.mubr.f32.mxu1 %v3056_v44 }
 0x30b   :  { %2527 = vmatprep.subr.mxu0 %v1424_v54 }
 0x30c   :  { %2528 = vmatpush3.msra.mxu0 %v1408_v55 }
 0x30d   :  { %2529 = vmatprep.subr.mxu0 %v1423_v56 }
 0x30e   :  { %2530 = vmatpush3.msra.mxu0 %v1407_v57 }
 0x30f   :  { %2531 = vmatprep.subr.mxu0 %v1422_v58  ;;  %v1521_v58 = vld [vmem:[#allocation5 + $0x18] sm:$0xff] }
 0x310   :  { %2532 = vmatpush3.msra.mxu0 %v1406_v59  ;;  %1553 = vmatprep.subr.mxu1 %v1521_v58  ;;  %v1520_v59 = vld [vmem:[#allocation5 + $0x10] sm:$0xff] }
 0x311   :  { %2533 = vmatprep.subr.mxu0 %v1421_v60  ;;  %v1519_v60 = vld [vmem:[#allocation5 + $0x8] sm:$0xff]  ;;  %1554 = vmatpush1.msra.mxu1 %v1520_v59  ;;  %v1811_v59 = vld [vmem:[%s4038_s10 + $0x38] sm:$0xff] }
 0x312   :  { %2534 = vmatpush3.msra.mxu0 %v1405_v61  ;;  %v1518_v61 = vld [vmem:[#allocation5] sm:$0xff]  ;;  %1555 = vmatprep.subr.mxu1 %v1519_v60  ;;  %v1810_v60 = vld [vmem:[%s4038_s10 + $0x30] sm:$0xff] }
 0x313   :  { %2535 = vmatprep.subr.mxu0 %v1420_v62  ;;  %1556 = vmatpush1.msra.mxu1 %v1518_v61  ;;  %v2853_v62 = vld [vmem:[%s4037_s9 + $0x78] sm:$0xff]   ;;  %v1809_v61 = vld [vmem:[%s4038_s10 + $0x28] sm:$0xff] }
 0x314   :  { %2536 = vmatpush3.msra.mxu0 %v1404_v63  ;;  %2556 = vmatprep.subr.bf16.mxu1 %v2853_v62  ;;  %v1808_v62 = vld [vmem:[%s4038_s10 + $0x20] sm:$0xff] }
 0x315   :  { %2537 = vmatprep.subr.mxu0 %v1419_v0 }
 0x316   :  { %2538 = vmatpush3.msra.mxu0 %v1403_v1 }
 0x317   :  { %2539 = vmatprep.subr.mxu0 %v1418_v2 }
 0x318   :  { %2540 = vmatpush3.msra.mxu0 %v1402_v3 }
 0x319   :  { %2541 = vmatprep.subr.mxu0 %v1417_v4 }
 0x31a   :  { %2542 = vmatpush3.msra.mxu0 %v1401_v5 }
 0x31b   :  { %2543 = vmatprep.subr.mxu0 %v1416_v6 }
 0x31c   :  { %2544 = vmatpush3.msra.mxu0 %v1400_v7 }
 0x31d   :  { %2545 = vmatprep.subr.mxu0 %v1415_v8 }
 0x31e   :  { %2546 = vmatpush3.msra.mxu0 %v1399_v9  ;;  %v1507_v9 = vld [vmem:[#allocation7] sm:$0x3] }
 0x31f   :  { %2547 = vmatprep.subr.mxu0 %v1414_v10 }
 0x320   :  { %2548 = vmatpush3.msra.mxu0 %v1398_v11 }
 0x321   :  { %2549 = vmatprep.subr.mxu0 %v1413_v12 }
 0x322   :  { %2550 = vmatpush3.msra.mxu0 %v1397_v15 }
 0x323   :  { %2551 = vmatprep.subr.mxu0 %v1412_v16 }
 0x324   :  { %2552 = vmatpush3.msra.mxu0 %v1396_v17  ;;  %v2854_v17 = vld [vmem:[%s4037_s9 + $0x38] sm:$0xff]  }
 0x325   :  { %2615 = vmatprep.subr.mxu0 %v3056_v44 }
 0x3c5   :  { %v1320_v18 = vpop.f32.mrf.mxu0 }
 0x3c7   :  { %v1322_v19 = vpop.f32.mrf.mxu0 }
 0x3c9   :  { %v1324_v20 = vpop.f32.mrf.mxu0  ;;  %v1361_v21 = vpop.f32.mrf.mxu1 }
 0x3ca   :  { %v3834_v22 = vadd.f32 %v1361_v21, %v1320_v18  ;;  %v2855_v18 = vld [vmem:[%s4037_s9 + $0x70] sm:$0xff]   ;;  %v2857_v21 = vld [vmem:[%s4037_s9 + $0x68] sm:$0xff]  }
 0x3cb   :  { %v1325_v23 = vpop.f32.mrf.mxu0  ;;  %v1363_v24 = vpop.f32.mrf.mxu1  ;;  %v2856_v20 = vld [vmem:[%s4037_s9 + $0x30] sm:$0xff]  }
 0x3cc   :  { %v1368_v25 = vrot.slane %v3834_v22, 4  ;;  %v1380_v27 = vmul.f32 %v3834_v22, %v3834_v22  ;;  %v3839_v28 = vadd.f32 %v1363_v24, %v1322_v19  ;;  %v2858_v23 = vld [vmem:[%s4037_s9 + $0x28] sm:$0xff]   ;;  %v2859_v24 = vld [vmem:[%s4037_s9 + $0x60] sm:$0xff]  }
 0x3cd   :  { %v1365_v29 = vpop.f32.mrf.mxu1 }
 0x3ce   :  { %v1369_v35 = vadd.f32 %v1368_v25, %v3834_v22  ;;  %v1382_v30 = vrot.slane %v1380_v27, 4  ;;  %v1374_v31 = vrot.slane %v3839_v28, 4  ;;  %v1381_v32 = vmul.f32 %v3839_v28, %v3839_v28  ;;  %v2860_v25 = vld [vmem:[%s4037_s9 + $0x20] sm:$0xff]   ;;  %v2862_v29 = vld [vmem:[%s4037_s9 + $0x18] sm:$0xff]  }
 0x3cf   :  { %v1366_v33 = vpop.f32.mrf.mxu1 }
 0x3d0   :  { %v1370_v41 = vrot.slane %v1369_v35, 2  ;;  %v1383_v34 = vadd.f32 %v1382_v30, %v1380_v27  ;;  %v1375_v37 = vadd.f32 %v1374_v31, %v3839_v28  ;;  %v1388_v38 = vrot.slane %v1381_v32, 4  ;;  %v2861_v27 = vld [vmem:[%s4037_s9 + $0x58] sm:$0xff]   ;;  %v2864_v30 = vld [vmem:[%s4037_s9 + $0x10] sm:$0xff]   ;;  %v2865_v31 = vld [vmem:[%s4037_s9 + $0x48] sm:$0xff]  }
 0x3d1   :  { %v2867_v33 = vld [vmem:[%s4037_s9 + $0x40] sm:$0xff]  }
 0x3d2   :  { %v1376_v39 = vrot.slane %v1375_v37, 2  ;;  %v1389_v40 = vadd.f32 %v1388_v38, %v1381_v32  ;;  %v1384_v43 = vrot.slane %v1383_v34, 2  ;;  %v1371_v45 = vadd.f32 %v1370_v41, %v1369_v35  ;;  %v2863_v35 = vld [vmem:[%s4037_s9 + $0x50] sm:$0xff]   ;;  %v2866_v32 = vld [vmem:[%s4037_s9 + $0x8] sm:$0xff]   ;;  %v2868_v41 = vld [vmem:[%s4037_s9] sm:$0xff]  }
 0x3d3   :  { %v1817_v38 = vld [vmem:[%s4038_s10 + $0x68] sm:$0xff] }
 0x3d4   :  { %v1377_v46 = vadd.f32 %v1376_v39, %v1375_v37  ;;  %v1390_v47 = vrot.slane %v1389_v40, 2  ;;  %v1385_v36 = vadd.f32 %v1384_v43, %v1383_v34  ;;  %v1372_v50 = vrot.slane %v1371_v45, 1  ;;  %v1819_v34 = vld [vmem:[%s4038_s10 + $0x78] sm:$0xff]  ;;  %v1818_v37 = vld [vmem:[%s4038_s10 + $0x70] sm:$0xff]  ;;  %v1816_v39 = vld [vmem:[%s4038_s10 + $0x60] sm:$0xff] }
 0x3d5   :  { %v1814_v43 = vld [vmem:[%s4038_s10 + $0x50] sm:$0xff] }
 0x3d6   :  { %v1378_v42 = vrot.slane %v1377_v46, 1  ;;  %v1391_v48 = vadd.f32 %v1390_v47, %v1389_v40  ;;  %v1386_v49 = vrot.slane %v1385_v36, 1  ;;  %v1373_v55 = vadd.f32 %v1372_v50, %v1371_v45  ;;  %v1815_v40 = vld [vmem:[%s4038_s10 + $0x58] sm:$0xff] }
 0x3d8   :  { %v1392_v51 = vrot.slane %v1391_v48, 1  ;;  %v1387_v52 = vadd.f32 %v1386_v49, %v1385_v36  ;;  %v1379_v53 = vadd.f32 %v1378_v42, %v1377_v46 }
 0x3da   :  { %v1393_v54 = vadd.f32 %v1392_v51, %v1391_v48  ;;  %v1394_v57 = vsel %vm467_vm0, %v1373_v55, %v1387_v52 }
 0x3dc   :  { %v1395_v56 = vsel %vm467_vm0, %v1379_v53, %v1393_v54 }
 0x3dd   :  { %1492 = vmatprep.mubr.f32.mxu0 %v1395_v56 }
 0x3de   :  { %1493 = vmatmul.mubr.f32.vlgmr.msra.gmra.mxu0 %v1394_v57 }
 0x3df   :  { %2616 = vmatpush3.msra.mxu0 %v1819_v34  ;;  %2647 = vmatprep.mubr.msk.f32.mxu0 %vm3057_vm3, %v3056_v44 }
 0x3e0   :  { %2617 = vmatprep.subr.mxu0 %v3056_v44 }
 0x3e1   :  { %2618 = vmatpush3.msra.mxu0 %v1818_v37  ;;  %v1899_v37 = vld [vmem:[%s4040_s12] sm:$0x3] }
 0x3e2   :  { %2619 = vmatprep.subr.mxu0 %v3056_v44 }
 0x3e3   :  { %2620 = vmatpush3.msra.mxu0 %v1817_v38 }
 0x3e4   :  { %2621 = vmatprep.subr.mxu0 %v3056_v44 }
 0x3e5   :  { %2622 = vmatpush3.msra.mxu0 %v1816_v39 }
 0x3e6   :  { %2623 = vmatprep.subr.mxu0 %v3056_v44 }
 0x3e7   :  { %2624 = vmatpush3.msra.mxu0 %v1815_v40 }
 0x3e8   :  { %2625 = vmatprep.subr.mxu0 %v3056_v44 }
 0x3e9   :  { %2626 = vmatpush3.msra.mxu0 %v1814_v43 }
 0x3ea   :  { %2627 = vmatprep.subr.mxu0 %v3056_v44 }
 0x49e   :  { %v2553_v63 = vpop.f32.mrf.mxu0 }
 0x4a0   :  { %v2554_v0 = vpop.f32.mrf.mxu0 }
 0x4a1   :  { %v2555_v1 = vadd.f32 %v2554_v0, %v2553_v63  ;;  %v1807_v63 = vld [vmem:[%s4038_s10 + $0x18] sm:$0xff]  ;;  %v1806_v0 = vld [vmem:[%s4038_s10 + $0x10] sm:$0xff] }
 0x4a3   :  { %v1498_v2 = vmul.f32 0.017857144, %v2555_v1  ;;  %v1805_v1 = vld [vmem:[%s4038_s10 + $0x8] sm:$0xff] }
 0x4a5   :  { %v1499_v3 = vmul.f32 %v1498_v2, %v1498_v2 }
 0x4a7   :  { %v1501_v4 = vrot.slane %v1499_v3, 7 }
 0x4a9   :  { %v1503_v5 = vsub.f32 %v1498_v2, %v1501_v4 }
 0x4ab   :  { %v1504_v6 = vmax.f32 %v1503_v5, 0.0 }
 0x4ad   :  { %v1505_v7 = vadd.f32 1e-05, %v1504_v6 }
 0x4af   :  { %2887 = vrsqrt.f32 %v1505_v7 }
 0x4bc   :  { %v2888_v8 = vpop.eup %2887 }
 0x4bd   :  { %v1509_v10 = vrot.slane %v2888_v8, 1 }
 0x4bf   :  { %v1511_v11 = vmul.f32 %v1509_v10, %v1507_v9 }
 0x4c1   :  { %v1512_v12 = vmul.f32 %v1511_v11, %v1498_v2  ;;  %v1804_v2 = vld [vmem:[%s4038_s10] sm:$0xff] }
 0x4c3   :  { %v1514_v15 = vrot.slane %v1512_v12, 7 }
 0x4c5   :  { %v1516_v16 = vsub.f32 %v1507_v9, %v1514_v15 }
 0x4c7   :  { %v1517_v19 = vsel %vm467_vm0, %v1511_v11, %v1516_v16 }
 0x4c8   :  { %2417 = vmatmul.mubr.msk.f32.vlgmr.msra.gmra.mxu1 %vm704_vm1, %v1517_v19 }
 0x4c9   :  { %2557 = vmatpush3.bf16.msra.mxu1 %v2854_v17 }
 0x4ca   :  { %2558 = vmatprep.subr.bf16.mxu1 %v2855_v18 }
 0x4cd   :  { %2559 = vmatpush3.bf16.msra.mxu1 %v2856_v20 }
 0x4ce   :  { %2560 = vmatprep.subr.bf16.mxu1 %v2857_v21 }
 0x4d1   :  { %2561 = vmatpush3.bf16.msra.mxu1 %v2858_v23 }
 0x4d2   :  { %2562 = vmatprep.subr.bf16.mxu1 %v2859_v24 }
 0x4d5   :  { %2563 = vmatpush3.bf16.msra.mxu1 %v2860_v25  ;;  %v1910_v25 = vld [vmem:[%s4039_s11] sm:$0xff] }
 0x4d6   :  { %2564 = vmatprep.subr.bf16.mxu1 %v2861_v27 }
 0x4d9   :  { %2565 = vmatpush3.bf16.msra.mxu1 %v2862_v29 }
 0x4da   :  { %2566 = vmatprep.subr.bf16.mxu1 %v2863_v35 }
 0x4dd   :  { %2567 = vmatpush3.bf16.msra.mxu1 %v2864_v30 }
 0x4de   :  { %2568 = vmatprep.subr.bf16.mxu1 %v2865_v31 }
 0x4e1   :  { %2569 = vmatpush3.bf16.msra.mxu1 %v2866_v32 }
 0x4e2   :  { %2570 = vmatprep.subr.bf16.mxu1 %v2867_v33 }
 0x4e5   :  { %2571 = vmatpush3.bf16.msra.mxu1 %v2868_v41 }
 0x4e6   :  { %2650 = vmatprep.subr.mxu1 %v3056_v44 }
 0x588   :  { %v1591_v45 = vpop.f32.mrf.mxu1 }
 0x589   :  { %v1599_v46 = vrot.slane %v1591_v45, %v3716_v13  ;;  %v1609_v42 = vrot.slane %v1591_v45, %v3718_v14 }
 0x58a   :  { %v1593_v47 = vpop.f32.mrf.mxu1 }
 0x58b   :  { %v1604_v36 = vmul.f32 %v1599_v46, %v3834_v22  ;;  %v1603_v48 = vrot.slane %v1593_v47, %v3716_v13  ;;  %v1613_v51 = vrot.slane %v1593_v47, %v3718_v14  ;;  %v1813_v22 = vld [vmem:[%s4038_s10 + $0x48] sm:$0xff]  ;;  %v2869_v46 = vld [vmem:[#allocation8 + $0x38] sm:$0xff]  }
 0x58c   :  { %2628 = vmatpush3.msra.mxu0 %v1813_v22 }
 0x58d   :  { %v1614_v49 = vadd.f32 %v1609_v42, %v1604_v36  ;;  %v1605_v50 = vmul.f32 %v1603_v48, %v3839_v28  ;;  %2629 = vmatprep.subr.mxu0 %v3056_v44  ;;  %v1812_v28 = vld [vmem:[%s4038_s10 + $0x40] sm:$0xff]  ;;  %v2870_v36 = vld [vmem:[#allocation8 + $0x30] sm:$0xff]   ;;  %v2871_v42 = vld [vmem:[#allocation8 + $0x28] sm:$0xff]  }
 0x58e   :  { %2630 = vmatpush3.msra.mxu0 %v1812_v28  ;;  %v2872_v48 = vld [vmem:[#allocation8 + $0x20] sm:$0xff]  }
 0x58f   :  { %v1616_v52 = vmax.f32 %v1614_v49, 0.0  ;;  %v1615_v53 = vadd.f32 %v1613_v51, %v1605_v50  ;;  %2631 = vmatprep.subr.mxu0 %v3056_v44  ;;  %v2873_v49 = vld [vmem:[#allocation8 + $0x18] sm:$0xff]   ;;  %v2874_v50 = vld [vmem:[#allocation8 + $0x10] sm:$0xff]   ;;  %v2875_v51 = vld [vmem:[#allocation8 + $0x8] sm:$0xff]  }
 0x590   :  { %2632 = vmatpush3.msra.mxu0 %v1811_v59 }
 0x591   :  { %v1617_v54 = vmax.f32 %v1615_v53, 0.0  ;;  %v1618_v55 = vmul.f32 %v3728_v26, %v1616_v52  ;;  %2633 = vmatprep.subr.mxu0 %v3056_v44  ;;  %v2876_v52 = vld [vmem:[#allocation8] sm:$0xff]  }
 0x592   :  { %2634 = vmatpush3.msra.mxu0 %v1810_v60  ;;  %v2877_v60 = vld [vmem:[#allocation10 + $0x38] sm:$0xff]  }
 0x593   :  { %v1619_v56 = vmul.f32 %v3728_v26, %v1617_v54  ;;  %v1620_v58 = vpack.c.bf16 %v1618_v55, %v1618_v55  ;;  %2635 = vmatprep.subr.mxu0 %v3056_v44 }
 0x594   :  { %2636 = vmatpush3.msra.mxu0 %v1809_v61  ;;  %v2878_v61 = vld [vmem:[#allocation10 + $0x30] sm:$0xff]  }
 0x595   :  { %v1621_v57 = vpack.c.bf16 %v1619_v56, %v1619_v56  ;;  %2637 = vmatprep.subr.mxu0 %v3056_v44 }
 0x596   :  { %2638 = vmatpush3.msra.mxu0 %v1808_v62  ;;  %v2879_v62 = vld [vmem:[#allocation10 + $0x28] sm:$0xff]  }
 0x597   :  { %1782 = vmatprep.mubr.bf16.mxu1 %v1621_v57  ;;  %2639 = vmatprep.subr.mxu0 %v3056_v44 }
 0x598   :  { %1783 = vmatmul.mubr.bf16.vlgmr.msra.gmra.mxu1 %v1620_v58  ;;  %2640 = vmatpush3.msra.mxu0 %v1807_v63  ;;  %v2880_v63 = vld [vmem:[#allocation10 + $0x20] sm:$0xff]  }
 0x599   :  { %2652 = vmatprep.mubr.msk.f32.mxu1 %vm3057_vm3, %v3056_v44  ;;  %2641 = vmatprep.subr.mxu0 %v3056_v44 }
 0x59a   :  { %2642 = vmatpush3.msra.mxu0 %v1806_v0  ;;  %2651 = vmatpush3.msra.mxu1 %v1910_v25  ;;  %v2881_v0 = vld [vmem:[#allocation10 + $0x18] sm:$0xff]  }
 0x59b   :  { %2643 = vmatprep.subr.mxu0 %v3056_v44  ;;  %2655 = vmatprep.subr.bf16.mxu1 %v3056_v44 }
 0x59c   :  { %2644 = vmatpush3.msra.mxu0 %v1805_v1  ;;  %v2882_v1 = vld [vmem:[#allocation10 + $0x10] sm:$0xff]  }
 0x59d   :  { %2645 = vmatprep.subr.mxu0 %v3056_v44 }
 0x59e   :  { %2646 = vmatpush3.msra.mxu0 %v1804_v2  ;;  %v2883_v2 = vld [vmem:[#allocation10 + $0x8] sm:$0xff]  }
 0x59f   :  { %2675 = vmatprep.subr.bf16.mxu0 %v3056_v44 }
 0x658   :  { %v2572_v3 = vpop.f32.mrf.mxu1 }
 0x65a   :  { %v2573_v4 = vpop.f32.mrf.mxu1 }
 0x65b   :  { %v3975_v5 = vadd.f32 %v2573_v4, %v2572_v3  ;;  %v2884_v3 = vld [vmem:[#allocation10] sm:$0xff]  }
 0x65c   :  { %v2575_v6 = vpop.f32.mrf.mxu1 }
 0x65d   :  { %v1790_v7 = vrot.slane %v3975_v5, 4  ;;  %v1796_v8 = vmul.f32 %v3975_v5, %v3975_v5 }
 0x65e   :  { %v2576_v9 = vpop.f32.mrf.mxu1 }
 0x65f   :  { %v1791_v10 = vadd.f32 %v3975_v5, %v1790_v7  ;;  %v1797_v11 = vrot.slane %v1796_v8, 4 }
 0x661   :  { %v1792_v12 = vrot.slane %v1791_v10, 2  ;;  %v1798_v15 = vadd.f32 %v1797_v11, %v1796_v8 }
 0x663   :  { %v1793_v16 = vadd.f32 %v1792_v12, %v1791_v10  ;;  %v1799_v17 = vrot.slane %v1798_v15, 2 }
 0x665   :  { %v1794_v18 = vrot.slane %v1793_v16, 1  ;;  %v1800_v19 = vadd.f32 %v1799_v17, %v1798_v15 }
 0x667   :  { %v1801_v20 = vrot.slane %v1800_v19, 1  ;;  %v1795_v21 = vadd.f32 %v1794_v18, %v1793_v16 }
 0x669   :  { %v1802_v23 = vadd.f32 %v1801_v20, %v1800_v19 }
 0x66b   :  { %v1803_v24 = vsel %vm467_vm0, %v1795_v21, %v1802_v23 }
 0x66c   :  { %2648 = vmatmul.mubr.f32.vlgmr.msra.gmra.mxu0 %v1803_v24 }
 0x66d   :  { %2691 = vmatprep.mubr.msk.bf16.mxu0 %vm3057_vm3, %v3056_v44  ;;  %2676 = vmatpush3.bf16.msra.mxu0 %v2877_v60 }
 0x66e   :  { %2677 = vmatprep.subr.bf16.mxu0 %v3056_v44 }
 0x671   :  { %2678 = vmatpush3.bf16.msra.mxu0 %v2878_v61 }
 0x672   :  { %2679 = vmatprep.subr.bf16.mxu0 %v3056_v44 }
 0x675   :  { %2680 = vmatpush3.bf16.msra.mxu0 %v2879_v62 }
 0x676   :  { %2681 = vmatprep.subr.bf16.mxu0 %v3056_v44 }
 0x679   :  { %2682 = vmatpush3.bf16.msra.mxu0 %v2880_v63 }
 0x67a   :  { %2683 = vmatprep.subr.bf16.mxu0 %v3056_v44 }
 0x67d   :  { %2684 = vmatpush3.bf16.msra.mxu0 %v2881_v0 }
 0x67e   :  { %2685 = vmatprep.subr.bf16.mxu0 %v3056_v44 }
 0x681   :  { %2686 = vmatpush3.bf16.msra.mxu0 %v2882_v1 }
 0x682   :  { %2687 = vmatprep.subr.bf16.mxu0 %v3056_v44 }
 0x685   :  { %2688 = vmatpush3.bf16.msra.mxu0 %v2883_v2 }
 0x686   :  { %2689 = vmatprep.subr.bf16.mxu0 %v3056_v44 }
 0x689   :  { %2690 = vmatpush3.bf16.msra.mxu0 %v2884_v3 }
 0x72c   :  { %v1886_v27 = vpop.f32.mrf.mxu0 }
 0x72d   :  { %v1890_v29 = vmul.f32 0.041666668, %v1886_v27 }
 0x72e   :  { %v2649_v35 = vpop.f32.mrf.mxu0 }
 0x72f   :  { %v1891_v30 = vmul.f32 %v1890_v29, %v1890_v29 }
 0x731   :  { %v1893_v31 = vrot.slane %v1891_v30, 7 }
 0x733   :  { %v1895_v32 = vsub.f32 %v1890_v29, %v1893_v31 }
 0x735   :  { %v1896_v33 = vmax.f32 %v1895_v32, 0.0  ;;  %v2125_v32 = vld [vmem:[%s4042_s14] sm:$0x3]  ;;  %s3058_s14 = smov [#allocation13]  }
 0x736   :  { %s2306_s15 = sshll.u32 %s3058_s14, 4  ;;  %s2307_s15 = int_to_ptr.vmem [resolvable:$true] %s2306_s15 }
 0x737   :  { %v1897_v41 = vadd.f32 1e-05, %v1896_v33  ;;  %s3015_s1 = scalar_lea.vmem %s2307_s15, 128  ;;  %p3020_p3 = scmp.lt.s32.totalorder %s2307_s15, %s2307_s15 }
 0x738   :  { %p3016_p2 = scmp.ne.s32.totalorder %s2307_s15, %s3015_s1  ;;  %p3021_p4 = scmp.lt.s32.totalorder %s3015_s1, %s3015_s1 }
 0x739   :  { %2889 = vrsqrt.f32 %v1897_v41 }
 0x73a   :  { %p3022_p5 = por %p3021_p4, %p3020_p3 }
 0x73c   :  { %p3023_p6 = pnand %p3022_p5, %p3016_p2 }
 0x746   :  { %v2890_v34 = vpop.eup %2889 }
 0x747   :  { %v1901_v38 = vrot.slane %v2890_v34, 1 }
 0x749   :  { %v1903_v39 = vmul.f32 %v1901_v38, %v1899_v37 }
 0x74b   :  { %v1904_v40 = vmul.f32 %v1903_v39, %v1890_v29 }
 0x74d   :  { %v1906_v43 = vrot.slane %v1904_v40, 7 }
 0x74f   :  { %v1908_v45 = vsub.f32 %v1899_v37, %v1906_v43 }
 0x751   :  { %v1909_v47 = vsel %vm467_vm0, %v1903_v39, %v1908_v45 }
 0x752   :  { %2653 = vmatmul.mubr.msk.f32.vlgmr.msra.gmra.mxu1 %vm1911_vm4, %v1909_v47 }
 0x753   :  { %2656 = vmatpush3.bf16.msra.mxu1 %v2869_v46  ;;  %2671 = vmatprep.mubr.msk.bf16.mxu1 %vm3057_vm3, %v3056_v44 }
 0x754   :  { %2657 = vmatprep.subr.bf16.mxu1 %v3056_v44 }
 0x757   :  { %2658 = vmatpush3.bf16.msra.mxu1 %v2870_v36 }
 0x758   :  { %2659 = vmatprep.subr.bf16.mxu1 %v3056_v44 }
 0x75b   :  { %2660 = vmatpush3.bf16.msra.mxu1 %v2871_v42 }
 0x75c   :  { %2661 = vmatprep.subr.bf16.mxu1 %v3056_v44 }
 0x75f   :  { %2662 = vmatpush3.bf16.msra.mxu1 %v2872_v48 }
 0x760   :  { %2663 = vmatprep.subr.bf16.mxu1 %v3056_v44 }
 0x763   :  { %2664 = vmatpush3.bf16.msra.mxu1 %v2873_v49 }
 0x764   :  { %2665 = vmatprep.subr.bf16.mxu1 %v3056_v44 }
 0x767   :  { %2666 = vmatpush3.bf16.msra.mxu1 %v2874_v50 }
 0x768   :  { %2667 = vmatprep.subr.bf16.mxu1 %v3056_v44 }
 0x76b   :  { %2668 = vmatpush3.bf16.msra.mxu1 %v2875_v51 }
 0x76c   :  { %2669 = vmatprep.subr.bf16.mxu1 %v3056_v44 }
 0x76f   :  { %2670 = vmatpush3.bf16.msra.mxu1 %v2876_v52 }
 0x812   :  { %v1981_v53 = vpop.f32.mrf.mxu1 }
 0x813   :  { %v1988_v54 = vrot.slane %v1981_v53, %v3716_v13  ;;  %v1993_v57 = vrot.slane %v1981_v53, %v3718_v14 }
 0x814   :  { %v2654_v55 = vpop.f32.mrf.mxu1 }
 0x815   :  { %v1989_v56 = vmul.f32 %v3975_v5, %v1988_v54 }
 0x817   :  { %v1994_v58 = vadd.f32 %v1993_v57, %v1989_v56 }
 0x819   :  { %v1995_v22 = vmax.f32 %v1994_v58, 0.0 }
 0x81b   :  { %v1996_v28 = vmul.f32 %v3728_v26, %v1995_v22 }
 0x81d   :  { %v1997_v59 = vpack.c.bf16 %v1996_v28, %v1996_v28 }
 0x81f   :  { %2672 = vmatmul.mubr.bf16.vlgmr.msra.gmra.mxu1 %v1997_v59 }
 0x8df   :  { %v2096_v4 = vpop.f32.mrf.mxu1 }
 0x8e0   :  { %v2102_v5 = vrot.slane %v2096_v4, 4  ;;  %v2108_v6 = vmul.f32 %v2096_v4, %v2096_v4 }
 0x8e1   :  { %v2673_v7 = vpop.f32.mrf.mxu1 }
 0x8e2   :  { %v2103_v8 = vadd.f32 %v2102_v5, %v2096_v4  ;;  %v2109_v9 = vrot.slane %v2108_v6, 4  ;;  %v2276_v7 = vld [vmem:[#allocation11] sm:$0x3] }
 0x8e3   :  { %v2099_v10 = vpop.f32.mrf.mxu1 }
 0x8e4   :  { %v2104_v11 = vrot.slane %v2103_v8, 2  ;;  %v2110_v12 = vadd.f32 %v2109_v9, %v2108_v6 }
 0x8e5   :  { %v2674_v15 = vpop.f32.mrf.mxu1 }
 0x8e6   :  { %v2105_v16 = vadd.f32 %v2104_v11, %v2103_v8  ;;  %v2111_v17 = vrot.slane %v2110_v12, 2 }
 0x8e8   :  { %v2106_v18 = vrot.slane %v2105_v16, 1  ;;  %v2112_v19 = vadd.f32 %v2111_v17, %v2110_v12 }
 0x8ea   :  { %v2113_v20 = vrot.slane %v2112_v19, 1  ;;  %v2107_v21 = vadd.f32 %v2106_v18, %v2105_v16 }
 0x8ec   :  { %v2114_v23 = vadd.f32 %v2113_v20, %v2112_v19 }
 0x8ee   :  { %v2115_v44 = vsel %vm467_vm0, %v2107_v21, %v2114_v23 }
 0x8ef   :  { %v2116_v24 = vmul.f32 0.25, %v2115_v44 }
 0x8f1   :  { %v2117_v25 = vmul.f32 %v2116_v24, %v2116_v24 }
 0x8f3   :  { %v2119_v27 = vrot.slane %v2117_v25, 7 }
 0x8f5   :  { %v2121_v29 = vsub.f32 %v2116_v24, %v2119_v27 }
 0x8f7   :  { %v2122_v35 = vmax.f32 %v2121_v29, 0.0 }
 0x8f9   :  { %v2123_v30 = vadd.f32 1e-05, %v2122_v35 }
 0x8fb   :  { %2891 = vrsqrt.f32 %v2123_v30 }
 0x908   :  { %v2892_v31 = vpop.eup %2891 }
 0x909   :  { %v2127_v33 = vrot.slane %v2892_v31, 1 }
 0x90b   :  { %v2129_v41 = vmul.f32 %v2127_v33, %v2125_v32 }
 0x90d   :  { %v2130_v34 = vmul.f32 %v2129_v41, %v2116_v24 }
 0x90f   :  { %v2132_v37 = vrot.slane %v2130_v34, 7 }
 0x911   :  { %v2134_v38 = vsub.f32 %v2125_v32, %v2132_v37 }
 0x913   :  { %v2135_v39 = vsel %vm467_vm0, %v2129_v41, %v2134_v38 }
 0x914   :  { %v2139_v40 = vrot.slane %v2135_v39, %v3716_v13  ;;  %v2144_v45 = vrot.slane %v2135_v39, %v3718_v14 }
 0x916   :  { %v2140_v43 = vmul.f32 %v2139_v40, %v2096_v4 }
 0x918   :  { %v2145_v46 = vadd.f32 %v2144_v45, %v2140_v43 }
 0x91a   :  { %v2146_v47 = vmax.f32 %v2145_v46, 0.0 }
 0x91c   :  { %v2147_v36 = vmul.f32 %v3728_v26, %v2146_v47 }
 0x91e   :  { %v2148_v42 = vpack.c.bf16 %v2147_v36, %v2147_v36 }
 0x920   :  { %2692 = vmatmul.mubr.bf16.vlgmr.msra.gmra.mxu0 %v2148_v42 }
 0x9e0   :  { %v2247_v48 = vpop.f32.mrf.mxu0 }
 0x9e1   :  { %v2253_v49 = vrot.slane %v2247_v48, 4  ;;  %v2259_v50 = vmul.f32 %v2247_v48, %v2247_v48 }
 0x9e2   :  { %v2693_v51 = vpop.f32.mrf.mxu0 }
 0x9e3   :  { %v2254_v52 = vadd.f32 %v2253_v49, %v2247_v48  ;;  %v2260_v53 = vrot.slane %v2259_v50, 4 }
 0x9e4   :  { %v2250_v54 = vpop.f32.mrf.mxu0 }
 0x9e5   :  { %v2255_v55 = vrot.slane %v2254_v52, 2  ;;  %v2261_v56 = vadd.f32 %v2260_v53, %v2259_v50 }
 0x9e6   :  { %v2694_v57 = vpop.f32.mrf.mxu0 }
 0x9e7   :  { %v2256_v58 = vadd.f32 %v2255_v55, %v2254_v52  ;;  %v2262_v22 = vrot.slane %v2261_v56, 2 }
 0x9e9   :  { %v2257_v28 = vrot.slane %v2256_v58, 1  ;;  %v2263_v59 = vadd.f32 %v2262_v22, %v2261_v56 }
 0x9eb   :  { %v2264_v60 = vrot.slane %v2263_v59, 1  ;;  %v2258_v61 = vadd.f32 %v2257_v28, %v2256_v58 }
 0x9ed   :  { %v2265_v62 = vadd.f32 %v2264_v60, %v2263_v59 }
 0x9ef   :  { %v2266_v63 = vsel %vm467_vm0, %v2258_v61, %v2265_v62 }
 0x9f0   :  { %v2267_v0 = vmul.f32 0.25, %v2266_v63 }
 0x9f2   :  { %v2268_v1 = vmul.f32 %v2267_v0, %v2267_v0 }
 0x9f4   :  { %v2270_v2 = vrot.slane %v2268_v1, 7 }
 0x9f6   :  { %v2272_v3 = vsub.f32 %v2267_v0, %v2270_v2 }
 0x9f8   :  { %v2273_v4 = vmax.f32 %v2272_v3, 0.0 }
 0x9fa   :  { %v2274_v5 = vadd.f32 1e-05, %v2273_v4 }
 0x9fc   :  { %2893 = vrsqrt.f32 %v2274_v5 }
 0xa09   :  { %v2894_v6 = vpop.eup %2893 }
 0xa0a   :  { %v2278_v8 = vrot.slane %v2894_v6, 1 }
 0xa0c   :  { %v2280_v9 = vmul.f32 %v2278_v8, %v2276_v7 }
 0xa0e   :  { %v2281_v10 = vmul.f32 %v2280_v9, %v2267_v0 }
 0xa10   :  { %v2283_v11 = vrot.slane %v2281_v10, 7 }
 0xa12   :  { %v2285_v12 = vsub.f32 %v2276_v7, %v2283_v11 }
 0xa14   :  { %v2286_v15 = vsel %vm467_vm0, %v2280_v9, %v2285_v12 }
 0xa15   :  { %v2290_v16 = vrot.slane %v2286_v15, %v3716_v13  ;;  %v2295_v18 = vrot.slane %v2286_v15, %v3718_v14 }
 0xa17   :  { %v2291_v17 = vmul.f32 %v2290_v16, %v2247_v48 }
 0xa19   :  { %v2296_v19 = vadd.f32 %v2295_v18, %v2291_v17 }
 0xa1b   :  { %v2297_v20 = vmax.f32 %v2296_v19, 0.0 }
 0xa1d   :  { %v2298_v21 = vmul.f32 %v3728_v26, %v2297_v20 }
 0xa1f   :  { %2299 = vst [vmem:[#allocation13] sm:$0xff] %v2298_v21 }
 0xa20   :  { %3026 = shalt.err (!%p3023_p6)
}
 0xa21   :  { %2309 = dma.vmem_to_hbm [thread:$0]  %s2307_s15, 128, %s4045_s17, [#allocation4]  }
 0xa22   :  { %3043 = dma.done.wait [#allocation4], 128  }
 0xa23   :  { %3044 = vsyncadd [#allocation4], 4294967168 }
 0xa24   :  { %2313 = vsyncpa [#allocation3], 1 }
 0xa25   :  { %2314 = vsyncpa [#allocation6], 1 }
 0xa26   :  { %2315 = vsyncpa [#allocation9], 1 }
 0xa27   :  { %2316 = vsyncpa [#allocation12], 1 }
 0xa28   :  { %2317 = vsyncpa [#allocation4], 1 }

</bundles_post_ra>
